<compile_context>
chip_gen: v5e
topology: v5e:2x2
jax: 0.10.0
libtpu: 0.0.40
codegen_flags: <defaults>
</compile_context>

<pallas_src>
import jax
import jax.numpy as jnp
from jax import lax
from jax.experimental import pallas as pl
from jax.experimental.pallas import tpu as pltpu

_BP = 8  # batch rows padded to one full sublane group


# ----------------------------------------------------------------------------
# Fused kernel
# ----------------------------------------------------------------------------
def fused_lstm_model_kernel(
    ids_ref,      # VMEM (T*Bp, 1) int32 token ids, time-major, batch padded
    table_ref,    # VMEM (Vpad, E)  embedding table (vocab padded to 128)
    wih1_ref,     # VMEM (E, 8H)   layer-1 input weights [gate-major, fwd|bwd]
    whh1_ref,     # VMEM (2H, 8H)  layer-1 recurrence weights, block-diag/gate
    b1_ref,       # VMEM (1, 8H)   layer-1 bias (b_ih + b_hh), packed
    wih2_ref,     # VMEM (2H, 8H)  layer-2 input weights [fwd 4H | bwd 4H]
    whh2f_ref,    # VMEM (H, 4H)   layer-2 forward recurrence weights
    b2_ref,       # VMEM (1, 8H)   layer-2 bias [fwd | bwd]
    wout_ref,     # VMEM (2H, OUT)
    bout_ref,     # VMEM (1, OUT)
    out_ref,      # VMEM (B, OUT)  output
):
    TB = ids_ref.shape[0]                                     # T * Bp
    Vpad = table_ref.shape[0]
    Bp = _BP
    T = TB // Bp
    H = whh2f_ref.shape[0]
    H2 = 2 * H
    B = out_ref.shape[0]
    f32 = jnp.float32

    # ---- Embedding: one one-hot MXU matmul (no scalar gather) --------------
    ids = ids_ref[...]                                        # (TB, 1) int32
    vocab = lax.broadcasted_iota(jnp.int32, (TB, Vpad), 1)
    onehot = (vocab == ids).astype(f32)                       # (TB, Vpad)
    emb = jnp.dot(onehot, table_ref[...],
                  preferred_element_type=f32)                 # (TB, E)

    # ---- Layer 1: both directions advanced together (8H packed gates) ------
    xg1 = jnp.dot(emb, wih1_ref[...],
                  preferred_element_type=f32) + b1_ref[...]   # (TB, 8H)
    # Column layout of the 8H gate axis: [i_f i_b | f_f f_b | g_f g_b | o_f o_b].
    col = lax.broadcasted_iota(jnp.int32, (1, 4 * H2), 1)
    fwd_cols = (col % H2) < H
    # Hoisted fwd/bwd time select (fwd reads time s, bwd reads time T-1-s):
    # one full-width where() before the recurrence, off the critical path.
    xg1_rev = jnp.concatenate(
        [xg1[(T - 1 - s) * Bp:(T - s) * Bp, :] for s in range(T)], axis=0)
    xin_all = jnp.where(fwd_cols, xg1, xg1_rev)               # (TB, 8H)

    whh1 = whh1_ref[...]
    h1 = jnp.zeros((Bp, H2), f32)                             # [h_fwd | h_bwd]
    c1 = jnp.zeros((Bp, H2), f32)
    out1_fwd = []                                             # fwd out @ time s
    out1_bwd = []                                             # bwd out @ time T-1-s
    for s in range(T):                                        # fully unrolled
        gates = xin_all[s * Bp:(s + 1) * Bp, :] + jnp.dot(
            h1, whh1, preferred_element_type=f32)             # (Bp, 8H)
        sg = jax.nn.sigmoid(gates)                            # full width (2 vregs)
        g = jnp.tanh(gates[:, 2 * H2:3 * H2])                 # g block only
        i = sg[:, 0 * H2:1 * H2]
        f = sg[:, 1 * H2:2 * H2]
        o = sg[:, 3 * H2:4 * H2]
        c1 = f * c1 + i * g
        h1 = o * jnp.tanh(c1)
        out1_fwd.append(h1[:, 0:H])
        out1_bwd.append(h1[:, H:H2])

    # Register-resident layer-1 outputs, time-major (no VMEM scratch).
    out1_f = jnp.concatenate(out1_fwd, axis=0)                # (TB, H)
    out1_b = jnp.concatenate(out1_bwd[::-1], axis=0)          # (TB, H)

    # ---- Layer 2: fwd + bwd input projections merged (256-wide matmul) -----
    # wih2 rows 0:H multiply the fwd half of out1, rows H:2H the bwd half;
    # columns 0:4H are forward-direction gates, 4H:8H backward-direction ones.
    xg2 = (jnp.dot(out1_f, wih2_ref[0:H, :], preferred_element_type=f32) +
           jnp.dot(out1_b, wih2_ref[H:H2, :], preferred_element_type=f32) +
           b2_ref[...])                                       # (TB, 8H)

    # Layer-2 forward recurrence: only the final hidden state is needed.
    whh2f = whh2f_ref[...]
    h2 = jnp.zeros((Bp, H), f32)
    c2 = jnp.zeros((Bp, H), f32)
    for s in range(T):                                        # fully unrolled
        gates = xg2[s * Bp:(s + 1) * Bp, 0:4 * H] + jnp.dot(
            h2, whh2f, preferred_element_type=f32)            # (Bp, 4H)
        sg = jax.nn.sigmoid(gates)
        g = jnp.tanh(gates[:, 2 * H:3 * H])
        i = sg[:, 0 * H:1 * H]
        f = sg[:, 1 * H:2 * H]
        o = sg[:, 3 * H:4 * H]
        c2 = f * c2 + i * g
        h2 = o * jnp.tanh(c2)

    # Layer-2 backward output at the last time step: exactly ONE step
    # (h0 = c0 = 0, so the recurrent term vanishes and w_hh_bwd is unused).
    gates_b = xg2[(T - 1) * Bp:T * Bp, 4 * H:8 * H]           # (Bp, 4H)
    sgb = jax.nn.sigmoid(gates_b)
    gb = jnp.tanh(gates_b[:, 2 * H:3 * H])
    ib = sgb[:, 0 * H:1 * H]
    ob = sgb[:, 3 * H:4 * H]
    cb = ib * gb
    hb = ob * jnp.tanh(cb)

    # ---- Output linear on hidden[:, -1, :] = [fwd_last | bwd_last] ---------
    res = (jnp.dot(h2, wout_ref[0:H, :], preferred_element_type=f32) +
           jnp.dot(hb, wout_ref[H:H2, :], preferred_element_type=f32) +
           bout_ref[...])                                     # (Bp, OUT)
    out_ref[...] = res[0:B, :]


# ----------------------------------------------------------------------------
# Wrapper: a single grid-less pallas_call (all data fits in VMEM easily)
# ----------------------------------------------------------------------------
_VMEM = pl.BlockSpec(memory_space=pltpu.MemorySpace.VMEM)


def lstm_model_forward(params, text):
    """text: (B, T) int token ids -> (B, text_embedding_size) float32."""
    B, T = text.shape
    assert B <= _BP, "kernel packs the batch into one 8-sublane group"
    kp = params["kernel"]
    OUT = kp["w_out"].shape[1]
    # Time-major token ids, batch padded to the 8-sublane granularity; the
    # one-hot gather is built from this tiny VMEM column inside the kernel.
    ids_tm = jnp.zeros((T, _BP), jnp.int32)
    ids_tm = ids_tm.at[:, :B].set(jnp.transpose(text).astype(jnp.int32))
    ids_tm = ids_tm.reshape(T * _BP, 1)
    return pl.pallas_call(
        fused_lstm_model_kernel,
        out_shape=jax.ShapeDtypeStruct((B, OUT), jnp.float32),
        in_specs=[_VMEM] * 10,
        out_specs=_VMEM,
    )(ids_tm, kp["table_pad"], kp["wih1_p"], kp["whh1_p"], kp["b1_p"],
      kp["wih2_p"], kp["whh2_f"], kp["b2_p"], kp["w_out"], kp["b_out"])


# ----------------------------------------------------------------------------
# Parameter init (PyTorch-style shapes/distributions) + one-time packing
# ----------------------------------------------------------------------------
def init_params(key, obs_size, word_embedding_size=32, hidden_dim=32,
                text_embedding_size=32):
    H = hidden_dim
    E = word_embedding_size
    keys = jax.random.split(key, 20)
    it = iter(keys)
    nxt = lambda: next(it)

    raw = {}
    # nn.Embedding: weight ~ N(0, 1)
    raw["embedding"] = jax.random.normal(nxt(), (obs_size, E), jnp.float32)

    # nn.LSTM(E, H, num_layers=2, bidirectional=True): U(-1/sqrt(H), 1/sqrt(H))
    bound = 1.0 / jnp.sqrt(jnp.float32(H))
    lstm = []
    for layer in range(2):
        in_size = E if layer == 0 else 2 * H
        layer_p = {}
        for direction in ("fwd", "bwd"):
            w_ih = jax.random.uniform(nxt(), (in_size, 4 * H), jnp.float32,
                                      -bound, bound)
            w_hh = jax.random.uniform(nxt(), (H, 4 * H), jnp.float32,
                                      -bound, bound)
            b_ih = jax.random.uniform(nxt(), (1, 4 * H), jnp.float32,
                                      -bound, bound)
            b_hh = jax.random.uniform(nxt(), (1, 4 * H), jnp.float32,
                                      -bound, bound)
            layer_p[direction] = (w_ih, w_hh, b_ih + b_hh)
        lstm.append(layer_p)
    raw["lstm"] = lstm

    # nn.Linear(2H, text_embedding_size)
    lb = 1.0 / jnp.sqrt(jnp.float32(2 * H))
    raw["w_out"] = jax.random.uniform(nxt(), (2 * H, text_embedding_size),
                                      jnp.float32, -lb, lb)
    raw["b_out"] = jax.random.uniform(nxt(), (1, text_embedding_size),
                                      jnp.float32, -lb, lb)

    # ---- One-time packing for the fused kernel ------------------------------
    # Vocab padded to a lane multiple so the one-hot gather matmul is aligned.
    # (For very large vocabularies the table should stay in HBM instead and be
    #  gathered with a manual DMA; at obs_size ~ 100 VMEM residency is best.)
    v_pad = ((obs_size + 127) // 128) * 128
    table_pad = jnp.zeros((v_pad, E), jnp.float32).at[:obs_size, :].set(
        raw["embedding"])

    # Layer 1: column layout of the 8H gate axis is
    #   [i_f i_b | f_f f_b | g_f g_b | o_f o_b]
    w_ih_f, w_hh_f, b_f = raw["lstm"][0]["fwd"]
    w_ih_b, w_hh_b, b_b = raw["lstm"][0]["bwd"]
    wih1_p = jnp.zeros((E, 8 * H), jnp.float32)
    whh1_p = jnp.zeros((2 * H, 8 * H), jnp.float32)   # block-diag per gate
    b1_p = jnp.zeros((1, 8 * H), jnp.float32)
    for k in range(4):
        c0, c1, c2 = k * 2 * H, k * 2 * H + H, (k + 1) * 2 * H
        wih1_p = wih1_p.at[:, c0:c1].set(w_ih_f[:, k * H:(k + 1) * H])
        wih1_p = wih1_p.at[:, c1:c2].set(w_ih_b[:, k * H:(k + 1) * H])
        whh1_p = whh1_p.at[0:H, c0:c1].set(w_hh_f[:, k * H:(k + 1) * H])
        whh1_p = whh1_p.at[H:2 * H, c1:c2].set(w_hh_b[:, k * H:(k + 1) * H])
        b1_p = b1_p.at[:, c0:c1].set(b_f[:, k * H:(k + 1) * H])
        b1_p = b1_p.at[:, c1:c2].set(b_b[:, k * H:(k + 1) * H])

    # Layer 2: fwd and bwd input projections packed side by side (256 wide);
    # w_hh of the backward direction is unused (initial state is zero and only
    # the last-step backward output is consumed).
    w_ih_f2, w_hh_f2, b_f2 = raw["lstm"][1]["fwd"]
    w_ih_b2, _w_hh_b2, b_b2 = raw["lstm"][1]["bwd"]
    wih2_p = jnp.concatenate([w_ih_f2, w_ih_b2], axis=1)   # (2H, 8H)
    b2_p = jnp.concatenate([b_f2, b_b2], axis=1)           # (1, 8H)

    kernel_params = {
        "table_pad": table_pad,
        "wih1_p": wih1_p, "whh1_p": whh1_p, "b1_p": b1_p,
        "wih2_p": wih2_p, "whh2_f": w_hh_f2, "b2_p": b2_p,
        "w_out": raw["w_out"], "b_out": raw["b_out"],
    }
    return {"raw": raw, "kernel": kernel_params}


# ----------------------------------------------------------------------------
# Pure-JAX reference (same math, no Pallas) for a tight sanity check
# ----------------------------------------------------------------------------
def _ref_lstm_dir(x_tbi, w_ih, w_hh, b):
    T, B, _ = x_tbi.shape
    H = w_hh.shape[0]

    def step(carry, x_t):
        h, c = carry
        gates = x_t @ w_ih + h @ w_hh + b
        i = jax.nn.sigmoid(gates[:, 0 * H:1 * H])
        f = jax.nn.sigmoid(gates[:, 1 * H:2 * H])
        g = jnp.tanh(gates[:, 2 * H:3 * H])
        o = jax.nn.sigmoid(gates[:, 3 * H:4 * H])
        c = f * c + i * g
        h = o * jnp.tanh(c)
        return (h, c), h

    init = (jnp.zeros((B, H), jnp.float32), jnp.zeros((B, H), jnp.float32))
    _, ys = lax.scan(step, init, x_tbi)
    return ys


def lstm_model_reference(params, text):
    raw = params["raw"]
    emb = raw["embedding"][text]
    x = jnp.transpose(emb, (1, 0, 2))
    for layer in range(2):
        w_ih_f, w_hh_f, b_f = raw["lstm"][layer]["fwd"]
        w_ih_b, w_hh_b, b_b = raw["lstm"][layer]["bwd"]
        y_fwd = _ref_lstm_dir(x, w_ih_f, w_hh_f, b_f)
        y_bwd = jnp.flip(_ref_lstm_dir(jnp.flip(x, 0), w_ih_b, w_hh_b, b_b), 0)
        x = jnp.concatenate([y_fwd, y_bwd], axis=-1)
    return x[-1] @ raw["w_out"] + raw["b_out"]


# ----------------------------------------------------------------------------
if __name__ == "__main__":
    OBS_SIZE = 100
    BATCH, SEQ = 2, 8
    WORD_EMB, HIDDEN, TEXT_EMB = 32, 32, 32

    key = jax.random.PRNGKey(0)
    k_params, k_text = jax.random.split(key)

    params = init_params(k_params, OBS_SIZE, WORD_EMB, HIDDEN, TEXT_EMB)
    text = jax.random.randint(k_text, (BATCH, SEQ), 0, OBS_SIZE, jnp.int32)

    out = jax.block_until_ready(jax.jit(lstm_model_forward)(params, text))
    assert out.shape == (BATCH, TEXT_EMB), out.shape

    ref = jax.block_until_ready(jax.jit(lstm_model_reference)(params, text))
    assert jnp.allclose(out, ref, rtol=1e-5, atol=1e-5), (
        float(jnp.max(jnp.abs(out - ref))))

    print("KERNEL_OK")
</pallas_src>

<mosaic_0001>
module attributes {stable_mosaic.version = 11 : i64} {
  func.func @fused_lstm_model_kernel(%arg0: memref<64x1xi32, #tpu.memory_space<vmem>>, %arg1: memref<128x32xf32, #tpu.memory_space<vmem>>, %arg2: memref<32x256xf32, #tpu.memory_space<vmem>>, %arg3: memref<64x256xf32, #tpu.memory_space<vmem>>, %arg4: memref<1x256xf32, #tpu.memory_space<vmem>>, %arg5: memref<64x256xf32, #tpu.memory_space<vmem>>, %arg6: memref<32x128xf32, #tpu.memory_space<vmem>>, %arg7: memref<1x256xf32, #tpu.memory_space<vmem>>, %arg8: memref<64x32xf32, #tpu.memory_space<vmem>>, %arg9: memref<1x32xf32, #tpu.memory_space<vmem>>, %arg10: memref<2x32xf32, #tpu.memory_space<vmem>>) attributes {dimension_semantics = [], scalar_prefetch = 0 : i64, scratch_operands = 0 : i64, tpu.core_type = #tpu.core_type<tc>} {
    %c0 = arith.constant 0 : index
    %c0_0 = arith.constant 0 : index
    %0 = vector.load %arg0[%c0, %c0_0] : memref<64x1xi32, #tpu.memory_space<vmem>>, vector<64x1xi32>
    %1 = tpu.iota {dimensions = array<i32: 1>} : vector<64x128xi32>
    %2 = vector.broadcast %0 : vector<64x1xi32> to vector<64x128xi32>
    %3 = arith.cmpi eq, %1, %2 : vector<64x128xi32>
    %4 = arith.extui %3 : vector<64x128xi1> to vector<64x128xi32>
    %5 = arith.sitofp %4 : vector<64x128xi32> to vector<64x128xf32>
    %c0_1 = arith.constant 0 : index
    %c0_2 = arith.constant 0 : index
    %6 = vector.load %arg1[%c0_1, %c0_2] : memref<128x32xf32, #tpu.memory_space<vmem>>, vector<128x32xf32>
    %cst = arith.constant dense<0.000000e+00> : vector<64x32xf32>
    %7 = tpu.matmul %5, %6, %cst {dimension_numbers = #tpu.dot_dimension_numbers<[1], [0], [0], [1], [0, 0, 1, 1], [], []>} : vector<64x128xf32>, vector<128x32xf32>, vector<64x32xf32> -> vector<64x32xf32>
    %c0_3 = arith.constant 0 : index
    %c0_4 = arith.constant 0 : index
    %8 = vector.load %arg2[%c0_3, %c0_4] : memref<32x256xf32, #tpu.memory_space<vmem>>, vector<32x256xf32>
    %cst_5 = arith.constant dense<0.000000e+00> : vector<64x256xf32>
    %9 = tpu.matmul %7, %8, %cst_5 {dimension_numbers = #tpu.dot_dimension_numbers<[1], [0], [0], [1], [0, 0, 1, 1], [], []>} : vector<64x32xf32>, vector<32x256xf32>, vector<64x256xf32> -> vector<64x256xf32>
    %c0_6 = arith.constant 0 : index
    %c0_7 = arith.constant 0 : index
    %10 = vector.load %arg4[%c0_6, %c0_7] : memref<1x256xf32, #tpu.memory_space<vmem>>, vector<1x256xf32>
    %11 = vector.broadcast %10 : vector<1x256xf32> to vector<64x256xf32>
    %12 = arith.addf %9, %11 : vector<64x256xf32>
    %13 = tpu.iota {dimensions = array<i32: 1>} : vector<1x256xi32>
    %c64_i32 = arith.constant 64 : i32
    %c0_i32 = arith.constant 0 : i32
    %14 = arith.cmpi eq, %c64_i32, %c0_i32 : i32
    %c1_i32 = arith.constant 1 : i32
    %15 = arith.select %14, %c1_i32, %c64_i32 : i32
    %16 = vector.broadcast %15 : i32 to vector<1x256xi32>
    %17 = arith.remsi %13, %16 : vector<1x256xi32>
    %c0_i32_8 = arith.constant 0 : i32
    %18 = vector.broadcast %c0_i32_8 : i32 to vector<1x256xi32>
    %19 = arith.cmpi ne, %17, %18 : vector<1x256xi32>
    %c0_i32_9 = arith.constant 0 : i32
    %20 = vector.broadcast %c0_i32_9 : i32 to vector<1x256xi32>
    %21 = arith.cmpi slt, %17, %20 : vector<1x256xi32>
    %c0_i32_10 = arith.constant 0 : i32
    %22 = arith.cmpi slt, %15, %c0_i32_10 : i32
    %23 = vector.broadcast %22 : i1 to vector<1x256xi1>
    %24 = vector.broadcast %23 : vector<1x256xi1> to vector<1x256xi1>
    %25 = arith.xori %21, %24 : vector<1x256xi1>
    %26 = arith.andi %25, %19 : vector<1x256xi1>
    %27 = vector.broadcast %15 : i32 to vector<1x256xi32>
    %28 = arith.addi %17, %27 : vector<1x256xi32>
    %29 = arith.select %26, %28, %17 : vector<1x256xi1>, vector<1x256xi32>
    %c32_i32 = arith.constant 32 : i32
    %30 = vector.broadcast %c32_i32 : i32 to vector<1x256xi32>
    %31 = arith.cmpi slt, %29, %30 : vector<1x256xi32>
    %32 = vector.extract_strided_slice %12 {offsets = [56, 0], sizes = [8, 256], strides = [1, 1]} : vector<64x256xf32> to vector<8x256xf32>
    %33 = vector.extract_strided_slice %12 {offsets = [48, 0], sizes = [8, 256], strides = [1, 1]} : vector<64x256xf32> to vector<8x256xf32>
    %34 = vector.extract_strided_slice %12 {offsets = [40, 0], sizes = [8, 256], strides = [1, 1]} : vector<64x256xf32> to vector<8x256xf32>
    %35 = vector.extract_strided_slice %12 {offsets = [32, 0], sizes = [8, 256], strides = [1, 1]} : vector<64x256xf32> to vector<8x256xf32>
    %36 = vector.extract_strided_slice %12 {offsets = [24, 0], sizes = [8, 256], strides = [1, 1]} : vector<64x256xf32> to vector<8x256xf32>
    %37 = vector.extract_strided_slice %12 {offsets = [16, 0], sizes = [8, 256], strides = [1, 1]} : vector<64x256xf32> to vector<8x256xf32>
    %38 = vector.extract_strided_slice %12 {offsets = [8, 0], sizes = [8, 256], strides = [1, 1]} : vector<64x256xf32> to vector<8x256xf32>
    %39 = vector.extract_strided_slice %12 {offsets = [0, 0], sizes = [8, 256], strides = [1, 1]} : vector<64x256xf32> to vector<8x256xf32>
    %40 = tpu.concatenate %32, %33, %34, %35, %36, %37, %38, %39 in 0 : vector<8x256xf32>, vector<8x256xf32>, vector<8x256xf32>, vector<8x256xf32>, vector<8x256xf32>, vector<8x256xf32>, vector<8x256xf32>, vector<8x256xf32> -> vector<64x256xf32>
    %41 = vector.shape_cast %31 : vector<1x256xi1> to vector<1x256xi1>
    %42 = vector.broadcast %41 : vector<1x256xi1> to vector<64x256xi1>
    %43 = arith.select %42, %12, %40 : vector<64x256xi1>, vector<64x256xf32>
    %c0_11 = arith.constant 0 : index
    %c0_12 = arith.constant 0 : index
    %44 = vector.load %arg3[%c0_11, %c0_12] : memref<64x256xf32, #tpu.memory_space<vmem>>, vector<64x256xf32>
    %cst_13 = arith.constant 0.000000e+00 : f32
    %45 = vector.broadcast %cst_13 : f32 to vector<8x64xf32>
    %cst_14 = arith.constant 0.000000e+00 : f32
    %46 = vector.broadcast %cst_14 : f32 to vector<8x64xf32>
    %47 = vector.extract_strided_slice %43 {offsets = [0, 0], sizes = [8, 256], strides = [1, 1]} : vector<64x256xf32> to vector<8x256xf32>
    %cst_15 = arith.constant dense<0.000000e+00> : vector<8x256xf32>
    %48 = tpu.matmul %45, %44, %cst_15 {dimension_numbers = #tpu.dot_dimension_numbers<[1], [0], [0], [1], [0, 0, 1, 1], [], []>} : vector<8x64xf32>, vector<64x256xf32>, vector<8x256xf32> -> vector<8x256xf32>
    %49 = arith.addf %47, %48 : vector<8x256xf32>
    %50 = arith.negf %49 : vector<8x256xf32>
    %51 = math.exp %50 : vector<8x256xf32>
    %cst_16 = arith.constant 1.000000e+00 : f32
    %52 = vector.broadcast %cst_16 : f32 to vector<8x256xf32>
    %53 = arith.addf %52, %51 : vector<8x256xf32>
    %54 = arith.divf %52, %53 : vector<8x256xf32>
    %55 = vector.extract_strided_slice %49 {offsets = [0, 128], sizes = [8, 64], strides = [1, 1]} : vector<8x256xf32> to vector<8x64xf32>
    %56 = math.tanh %55 : vector<8x64xf32>
    %57 = vector.extract_strided_slice %54 {offsets = [0, 0], sizes = [8, 64], strides = [1, 1]} : vector<8x256xf32> to vector<8x64xf32>
    %58 = vector.extract_strided_slice %54 {offsets = [0, 64], sizes = [8, 64], strides = [1, 1]} : vector<8x256xf32> to vector<8x64xf32>
    %59 = vector.extract_strided_slice %54 {offsets = [0, 192], sizes = [8, 64], strides = [1, 1]} : vector<8x256xf32> to vector<8x64xf32>
    %60 = arith.mulf %58, %46 : vector<8x64xf32>
    %61 = arith.mulf %57, %56 : vector<8x64xf32>
    %62 = arith.addf %60, %61 : vector<8x64xf32>
    %63 = math.tanh %62 : vector<8x64xf32>
    %64 = arith.mulf %59, %63 : vector<8x64xf32>
    %65 = vector.extract_strided_slice %64 {offsets = [0, 0], sizes = [8, 32], strides = [1, 1]} : vector<8x64xf32> to vector<8x32xf32>
    %66 = vector.extract_strided_slice %64 {offsets = [0, 32], sizes = [8, 32], strides = [1, 1]} : vector<8x64xf32> to vector<8x32xf32>
    %67 = vector.extract_strided_slice %43 {offsets = [8, 0], sizes = [8, 256], strides = [1, 1]} : vector<64x256xf32> to vector<8x256xf32>
    %cst_17 = arith.constant dense<0.000000e+00> : vector<8x256xf32>
    %68 = tpu.matmul %64, %44, %cst_17 {dimension_numbers = #tpu.dot_dimension_numbers<[1], [0], [0], [1], [0, 0, 1, 1], [], []>} : vector<8x64xf32>, vector<64x256xf32>, vector<8x256xf32> -> vector<8x256xf32>
    %69 = arith.addf %67, %68 : vector<8x256xf32>
    %70 = arith.negf %69 : vector<8x256xf32>
    %71 = math.exp %70 : vector<8x256xf32>
    %cst_18 = arith.constant 1.000000e+00 : f32
    %72 = vector.broadcast %cst_18 : f32 to vector<8x256xf32>
    %73 = arith.addf %72, %71 : vector<8x256xf32>
    %74 = arith.divf %72, %73 : vector<8x256xf32>
    %75 = vector.extract_strided_slice %69 {offsets = [0, 128], sizes = [8, 64], strides = [1, 1]} : vector<8x256xf32> to vector<8x64xf32>
    %76 = math.tanh %75 : vector<8x64xf32>
    %77 = vector.extract_strided_slice %74 {offsets = [0, 0], sizes = [8, 64], strides = [1, 1]} : vector<8x256xf32> to vector<8x64xf32>
    %78 = vector.extract_strided_slice %74 {offsets = [0, 64], sizes = [8, 64], strides = [1, 1]} : vector<8x256xf32> to vector<8x64xf32>
    %79 = vector.extract_strided_slice %74 {offsets = [0, 192], sizes = [8, 64], strides = [1, 1]} : vector<8x256xf32> to vector<8x64xf32>
    %80 = arith.mulf %78, %62 : vector<8x64xf32>
    %81 = arith.mulf %77, %76 : vector<8x64xf32>
    %82 = arith.addf %80, %81 : vector<8x64xf32>
    %83 = math.tanh %82 : vector<8x64xf32>
    %84 = arith.mulf %79, %83 : vector<8x64xf32>
    %85 = vector.extract_strided_slice %84 {offsets = [0, 0], sizes = [8, 32], strides = [1, 1]} : vector<8x64xf32> to vector<8x32xf32>
    %86 = vector.extract_strided_slice %84 {offsets = [0, 32], sizes = [8, 32], strides = [1, 1]} : vector<8x64xf32> to vector<8x32xf32>
    %87 = vector.extract_strided_slice %43 {offsets = [16, 0], sizes = [8, 256], strides = [1, 1]} : vector<64x256xf32> to vector<8x256xf32>
    %cst_19 = arith.constant dense<0.000000e+00> : vector<8x256xf32>
    %88 = tpu.matmul %84, %44, %cst_19 {dimension_numbers = #tpu.dot_dimension_numbers<[1], [0], [0], [1], [0, 0, 1, 1], [], []>} : vector<8x64xf32>, vector<64x256xf32>, vector<8x256xf32> -> vector<8x256xf32>
    %89 = arith.addf %87, %88 : vector<8x256xf32>
    %90 = arith.negf %89 : vector<8x256xf32>
    %91 = math.exp %90 : vector<8x256xf32>
    %cst_20 = arith.constant 1.000000e+00 : f32
    %92 = vector.broadcast %cst_20 : f32 to vector<8x256xf32>
    %93 = arith.addf %92, %91 : vector<8x256xf32>
    %94 = arith.divf %92, %93 : vector<8x256xf32>
    %95 = vector.extract_strided_slice %89 {offsets = [0, 128], sizes = [8, 64], strides = [1, 1]} : vector<8x256xf32> to vector<8x64xf32>
    %96 = math.tanh %95 : vector<8x64xf32>
    %97 = vector.extract_strided_slice %94 {offsets = [0, 0], sizes = [8, 64], strides = [1, 1]} : vector<8x256xf32> to vector<8x64xf32>
    %98 = vector.extract_strided_slice %94 {offsets = [0, 64], sizes = [8, 64], strides = [1, 1]} : vector<8x256xf32> to vector<8x64xf32>
    %99 = vector.extract_strided_slice %94 {offsets = [0, 192], sizes = [8, 64], strides = [1, 1]} : vector<8x256xf32> to vector<8x64xf32>
    %100 = arith.mulf %98, %82 : vector<8x64xf32>
    %101 = arith.mulf %97, %96 : vector<8x64xf32>
    %102 = arith.addf %100, %101 : vector<8x64xf32>
    %103 = math.tanh %102 : vector<8x64xf32>
    %104 = arith.mulf %99, %103 : vector<8x64xf32>
    %105 = vector.extract_strided_slice %104 {offsets = [0, 0], sizes = [8, 32], strides = [1, 1]} : vector<8x64xf32> to vector<8x32xf32>
    %106 = vector.extract_strided_slice %104 {offsets = [0, 32], sizes = [8, 32], strides = [1, 1]} : vector<8x64xf32> to vector<8x32xf32>
    %107 = vector.extract_strided_slice %43 {offsets = [24, 0], sizes = [8, 256], strides = [1, 1]} : vector<64x256xf32> to vector<8x256xf32>
    %cst_21 = arith.constant dense<0.000000e+00> : vector<8x256xf32>
    %108 = tpu.matmul %104, %44, %cst_21 {dimension_numbers = #tpu.dot_dimension_numbers<[1], [0], [0], [1], [0, 0, 1, 1], [], []>} : vector<8x64xf32>, vector<64x256xf32>, vector<8x256xf32> -> vector<8x256xf32>
    %109 = arith.addf %107, %108 : vector<8x256xf32>
    %110 = arith.negf %109 : vector<8x256xf32>
    %111 = math.exp %110 : vector<8x256xf32>
    %cst_22 = arith.constant 1.000000e+00 : f32
    %112 = vector.broadcast %cst_22 : f32 to vector<8x256xf32>
    %113 = arith.addf %112, %111 : vector<8x256xf32>
    %114 = arith.divf %112, %113 : vector<8x256xf32>
    %115 = vector.extract_strided_slice %109 {offsets = [0, 128], sizes = [8, 64], strides = [1, 1]} : vector<8x256xf32> to vector<8x64xf32>
    %116 = math.tanh %115 : vector<8x64xf32>
    %117 = vector.extract_strided_slice %114 {offsets = [0, 0], sizes = [8, 64], strides = [1, 1]} : vector<8x256xf32> to vector<8x64xf32>
    %118 = vector.extract_strided_slice %114 {offsets = [0, 64], sizes = [8, 64], strides = [1, 1]} : vector<8x256xf32> to vector<8x64xf32>
    %119 = vector.extract_strided_slice %114 {offsets = [0, 192], sizes = [8, 64], strides = [1, 1]} : vector<8x256xf32> to vector<8x64xf32>
    %120 = arith.mulf %118, %102 : vector<8x64xf32>
    %121 = arith.mulf %117, %116 : vector<8x64xf32>
    %122 = arith.addf %120, %121 : vector<8x64xf32>
    %123 = math.tanh %122 : vector<8x64xf32>
    %124 = arith.mulf %119, %123 : vector<8x64xf32>
    %125 = vector.extract_strided_slice %124 {offsets = [0, 0], sizes = [8, 32], strides = [1, 1]} : vector<8x64xf32> to vector<8x32xf32>
    %126 = vector.extract_strided_slice %124 {offsets = [0, 32], sizes = [8, 32], strides = [1, 1]} : vector<8x64xf32> to vector<8x32xf32>
    %127 = vector.extract_strided_slice %43 {offsets = [32, 0], sizes = [8, 256], strides = [1, 1]} : vector<64x256xf32> to vector<8x256xf32>
    %cst_23 = arith.constant dense<0.000000e+00> : vector<8x256xf32>
    %128 = tpu.matmul %124, %44, %cst_23 {dimension_numbers = #tpu.dot_dimension_numbers<[1], [0], [0], [1], [0, 0, 1, 1], [], []>} : vector<8x64xf32>, vector<64x256xf32>, vector<8x256xf32> -> vector<8x256xf32>
    %129 = arith.addf %127, %128 : vector<8x256xf32>
    %130 = arith.negf %129 : vector<8x256xf32>
    %131 = math.exp %130 : vector<8x256xf32>
    %cst_24 = arith.constant 1.000000e+00 : f32
    %132 = vector.broadcast %cst_24 : f32 to vector<8x256xf32>
    %133 = arith.addf %132, %131 : vector<8x256xf32>
    %134 = arith.divf %132, %133 : vector<8x256xf32>
    %135 = vector.extract_strided_slice %129 {offsets = [0, 128], sizes = [8, 64], strides = [1, 1]} : vector<8x256xf32> to vector<8x64xf32>
    %136 = math.tanh %135 : vector<8x64xf32>
    %137 = vector.extract_strided_slice %134 {offsets = [0, 0], sizes = [8, 64], strides = [1, 1]} : vector<8x256xf32> to vector<8x64xf32>
    %138 = vector.extract_strided_slice %134 {offsets = [0, 64], sizes = [8, 64], strides = [1, 1]} : vector<8x256xf32> to vector<8x64xf32>
    %139 = vector.extract_strided_slice %134 {offsets = [0, 192], sizes = [8, 64], strides = [1, 1]} : vector<8x256xf32> to vector<8x64xf32>
    %140 = arith.mulf %138, %122 : vector<8x64xf32>
    %141 = arith.mulf %137, %136 : vector<8x64xf32>
    %142 = arith.addf %140, %141 : vector<8x64xf32>
    %143 = math.tanh %142 : vector<8x64xf32>
    %144 = arith.mulf %139, %143 : vector<8x64xf32>
    %145 = vector.extract_strided_slice %144 {offsets = [0, 0], sizes = [8, 32], strides = [1, 1]} : vector<8x64xf32> to vector<8x32xf32>
    %146 = vector.extract_strided_slice %144 {offsets = [0, 32], sizes = [8, 32], strides = [1, 1]} : vector<8x64xf32> to vector<8x32xf32>
    %147 = vector.extract_strided_slice %43 {offsets = [40, 0], sizes = [8, 256], strides = [1, 1]} : vector<64x256xf32> to vector<8x256xf32>
    %cst_25 = arith.constant dense<0.000000e+00> : vector<8x256xf32>
    %148 = tpu.matmul %144, %44, %cst_25 {dimension_numbers = #tpu.dot_dimension_numbers<[1], [0], [0], [1], [0, 0, 1, 1], [], []>} : vector<8x64xf32>, vector<64x256xf32>, vector<8x256xf32> -> vector<8x256xf32>
    %149 = arith.addf %147, %148 : vector<8x256xf32>
    %150 = arith.negf %149 : vector<8x256xf32>
    %151 = math.exp %150 : vector<8x256xf32>
    %cst_26 = arith.constant 1.000000e+00 : f32
    %152 = vector.broadcast %cst_26 : f32 to vector<8x256xf32>
    %153 = arith.addf %152, %151 : vector<8x256xf32>
    %154 = arith.divf %152, %153 : vector<8x256xf32>
    %155 = vector.extract_strided_slice %149 {offsets = [0, 128], sizes = [8, 64], strides = [1, 1]} : vector<8x256xf32> to vector<8x64xf32>
    %156 = math.tanh %155 : vector<8x64xf32>
    %157 = vector.extract_strided_slice %154 {offsets = [0, 0], sizes = [8, 64], strides = [1, 1]} : vector<8x256xf32> to vector<8x64xf32>
    %158 = vector.extract_strided_slice %154 {offsets = [0, 64], sizes = [8, 64], strides = [1, 1]} : vector<8x256xf32> to vector<8x64xf32>
    %159 = vector.extract_strided_slice %154 {offsets = [0, 192], sizes = [8, 64], strides = [1, 1]} : vector<8x256xf32> to vector<8x64xf32>
    %160 = arith.mulf %158, %142 : vector<8x64xf32>
    %161 = arith.mulf %157, %156 : vector<8x64xf32>
    %162 = arith.addf %160, %161 : vector<8x64xf32>
    %163 = math.tanh %162 : vector<8x64xf32>
    %164 = arith.mulf %159, %163 : vector<8x64xf32>
    %165 = vector.extract_strided_slice %164 {offsets = [0, 0], sizes = [8, 32], strides = [1, 1]} : vector<8x64xf32> to vector<8x32xf32>
    %166 = vector.extract_strided_slice %164 {offsets = [0, 32], sizes = [8, 32], strides = [1, 1]} : vector<8x64xf32> to vector<8x32xf32>
    %167 = vector.extract_strided_slice %43 {offsets = [48, 0], sizes = [8, 256], strides = [1, 1]} : vector<64x256xf32> to vector<8x256xf32>
    %cst_27 = arith.constant dense<0.000000e+00> : vector<8x256xf32>
    %168 = tpu.matmul %164, %44, %cst_27 {dimension_numbers = #tpu.dot_dimension_numbers<[1], [0], [0], [1], [0, 0, 1, 1], [], []>} : vector<8x64xf32>, vector<64x256xf32>, vector<8x256xf32> -> vector<8x256xf32>
    %169 = arith.addf %167, %168 : vector<8x256xf32>
    %170 = arith.negf %169 : vector<8x256xf32>
    %171 = math.exp %170 : vector<8x256xf32>
    %cst_28 = arith.constant 1.000000e+00 : f32
    %172 = vector.broadcast %cst_28 : f32 to vector<8x256xf32>
    %173 = arith.addf %172, %171 : vector<8x256xf32>
    %174 = arith.divf %172, %173 : vector<8x256xf32>
    %175 = vector.extract_strided_slice %169 {offsets = [0, 128], sizes = [8, 64], strides = [1, 1]} : vector<8x256xf32> to vector<8x64xf32>
    %176 = math.tanh %175 : vector<8x64xf32>
    %177 = vector.extract_strided_slice %174 {offsets = [0, 0], sizes = [8, 64], strides = [1, 1]} : vector<8x256xf32> to vector<8x64xf32>
    %178 = vector.extract_strided_slice %174 {offsets = [0, 64], sizes = [8, 64], strides = [1, 1]} : vector<8x256xf32> to vector<8x64xf32>
    %179 = vector.extract_strided_slice %174 {offsets = [0, 192], sizes = [8, 64], strides = [1, 1]} : vector<8x256xf32> to vector<8x64xf32>
    %180 = arith.mulf %178, %162 : vector<8x64xf32>
    %181 = arith.mulf %177, %176 : vector<8x64xf32>
    %182 = arith.addf %180, %181 : vector<8x64xf32>
    %183 = math.tanh %182 : vector<8x64xf32>
    %184 = arith.mulf %179, %183 : vector<8x64xf32>
    %185 = vector.extract_strided_slice %184 {offsets = [0, 0], sizes = [8, 32], strides = [1, 1]} : vector<8x64xf32> to vector<8x32xf32>
    %186 = vector.extract_strided_slice %184 {offsets = [0, 32], sizes = [8, 32], strides = [1, 1]} : vector<8x64xf32> to vector<8x32xf32>
    %187 = vector.extract_strided_slice %43 {offsets = [56, 0], sizes = [8, 256], strides = [1, 1]} : vector<64x256xf32> to vector<8x256xf32>
    %cst_29 = arith.constant dense<0.000000e+00> : vector<8x256xf32>
    %188 = tpu.matmul %184, %44, %cst_29 {dimension_numbers = #tpu.dot_dimension_numbers<[1], [0], [0], [1], [0, 0, 1, 1], [], []>} : vector<8x64xf32>, vector<64x256xf32>, vector<8x256xf32> -> vector<8x256xf32>
    %189 = arith.addf %187, %188 : vector<8x256xf32>
    %190 = arith.negf %189 : vector<8x256xf32>
    %191 = math.exp %190 : vector<8x256xf32>
    %cst_30 = arith.constant 1.000000e+00 : f32
    %192 = vector.broadcast %cst_30 : f32 to vector<8x256xf32>
    %193 = arith.addf %192, %191 : vector<8x256xf32>
    %194 = arith.divf %192, %193 : vector<8x256xf32>
    %195 = vector.extract_strided_slice %189 {offsets = [0, 128], sizes = [8, 64], strides = [1, 1]} : vector<8x256xf32> to vector<8x64xf32>
    %196 = math.tanh %195 : vector<8x64xf32>
    %197 = vector.extract_strided_slice %194 {offsets = [0, 0], sizes = [8, 64], strides = [1, 1]} : vector<8x256xf32> to vector<8x64xf32>
    %198 = vector.extract_strided_slice %194 {offsets = [0, 64], sizes = [8, 64], strides = [1, 1]} : vector<8x256xf32> to vector<8x64xf32>
    %199 = vector.extract_strided_slice %194 {offsets = [0, 192], sizes = [8, 64], strides = [1, 1]} : vector<8x256xf32> to vector<8x64xf32>
    %200 = arith.mulf %198, %182 : vector<8x64xf32>
    %201 = arith.mulf %197, %196 : vector<8x64xf32>
    %202 = arith.addf %200, %201 : vector<8x64xf32>
    %203 = math.tanh %202 : vector<8x64xf32>
    %204 = arith.mulf %199, %203 : vector<8x64xf32>
    %205 = vector.extract_strided_slice %204 {offsets = [0, 0], sizes = [8, 32], strides = [1, 1]} : vector<8x64xf32> to vector<8x32xf32>
    %206 = vector.extract_strided_slice %204 {offsets = [0, 32], sizes = [8, 32], strides = [1, 1]} : vector<8x64xf32> to vector<8x32xf32>
    %207 = tpu.concatenate %65, %85, %105, %125, %145, %165, %185, %205 in 0 : vector<8x32xf32>, vector<8x32xf32>, vector<8x32xf32>, vector<8x32xf32>, vector<8x32xf32>, vector<8x32xf32>, vector<8x32xf32>, vector<8x32xf32> -> vector<64x32xf32>
    %208 = tpu.concatenate %206, %186, %166, %146, %126, %106, %86, %66 in 0 : vector<8x32xf32>, vector<8x32xf32>, vector<8x32xf32>, vector<8x32xf32>, vector<8x32xf32>, vector<8x32xf32>, vector<8x32xf32>, vector<8x32xf32> -> vector<64x32xf32>
    %c0_31 = arith.constant 0 : index
    %c0_32 = arith.constant 0 : index
    %209 = vector.load %arg5[%c0_31, %c0_32] : memref<64x256xf32, #tpu.memory_space<vmem>>, vector<32x256xf32>
    %cst_33 = arith.constant dense<0.000000e+00> : vector<64x256xf32>
    %210 = tpu.matmul %207, %209, %cst_33 {dimension_numbers = #tpu.dot_dimension_numbers<[1], [0], [0], [1], [0, 0, 1, 1], [], []>} : vector<64x32xf32>, vector<32x256xf32>, vector<64x256xf32> -> vector<64x256xf32>
    %c32 = arith.constant 32 : index
    %c0_34 = arith.constant 0 : index
    %211 = vector.load %arg5[%c32, %c0_34] : memref<64x256xf32, #tpu.memory_space<vmem>>, vector<32x256xf32>
    %cst_35 = arith.constant dense<0.000000e+00> : vector<64x256xf32>
    %212 = tpu.matmul %208, %211, %cst_35 {dimension_numbers = #tpu.dot_dimension_numbers<[1], [0], [0], [1], [0, 0, 1, 1], [], []>} : vector<64x32xf32>, vector<32x256xf32>, vector<64x256xf32> -> vector<64x256xf32>
    %213 = arith.addf %210, %212 : vector<64x256xf32>
    %c0_36 = arith.constant 0 : index
    %c0_37 = arith.constant 0 : index
    %214 = vector.load %arg7[%c0_36, %c0_37] : memref<1x256xf32, #tpu.memory_space<vmem>>, vector<1x256xf32>
    %215 = vector.broadcast %214 : vector<1x256xf32> to vector<64x256xf32>
    %216 = arith.addf %213, %215 : vector<64x256xf32>
    %c0_38 = arith.constant 0 : index
    %c0_39 = arith.constant 0 : index
    %217 = vector.load %arg6[%c0_38, %c0_39] : memref<32x128xf32, #tpu.memory_space<vmem>>, vector<32x128xf32>
    %cst_40 = arith.constant 0.000000e+00 : f32
    %218 = vector.broadcast %cst_40 : f32 to vector<8x32xf32>
    %cst_41 = arith.constant 0.000000e+00 : f32
    %219 = vector.broadcast %cst_41 : f32 to vector<8x32xf32>
    %220 = vector.extract_strided_slice %216 {offsets = [0, 0], sizes = [8, 128], strides = [1, 1]} : vector<64x256xf32> to vector<8x128xf32>
    %cst_42 = arith.constant dense<0.000000e+00> : vector<8x128xf32>
    %221 = tpu.matmul %218, %217, %cst_42 {dimension_numbers = #tpu.dot_dimension_numbers<[1], [0], [0], [1], [0, 0, 1, 1], [], []>} : vector<8x32xf32>, vector<32x128xf32>, vector<8x128xf32> -> vector<8x128xf32>
    %222 = arith.addf %220, %221 : vector<8x128xf32>
    %223 = arith.negf %222 : vector<8x128xf32>
    %224 = math.exp %223 : vector<8x128xf32>
    %cst_43 = arith.constant 1.000000e+00 : f32
    %225 = vector.broadcast %cst_43 : f32 to vector<8x128xf32>
    %226 = arith.addf %225, %224 : vector<8x128xf32>
    %227 = arith.divf %225, %226 : vector<8x128xf32>
    %228 = vector.extract_strided_slice %222 {offsets = [0, 64], sizes = [8, 32], strides = [1, 1]} : vector<8x128xf32> to vector<8x32xf32>
    %229 = math.tanh %228 : vector<8x32xf32>
    %230 = vector.extract_strided_slice %227 {offsets = [0, 0], sizes = [8, 32], strides = [1, 1]} : vector<8x128xf32> to vector<8x32xf32>
    %231 = vector.extract_strided_slice %227 {offsets = [0, 32], sizes = [8, 32], strides = [1, 1]} : vector<8x128xf32> to vector<8x32xf32>
    %232 = vector.extract_strided_slice %227 {offsets = [0, 96], sizes = [8, 32], strides = [1, 1]} : vector<8x128xf32> to vector<8x32xf32>
    %233 = arith.mulf %231, %219 : vector<8x32xf32>
    %234 = arith.mulf %230, %229 : vector<8x32xf32>
    %235 = arith.addf %233, %234 : vector<8x32xf32>
    %236 = math.tanh %235 : vector<8x32xf32>
    %237 = arith.mulf %232, %236 : vector<8x32xf32>
    %238 = vector.extract_strided_slice %216 {offsets = [8, 0], sizes = [8, 128], strides = [1, 1]} : vector<64x256xf32> to vector<8x128xf32>
    %cst_44 = arith.constant dense<0.000000e+00> : vector<8x128xf32>
    %239 = tpu.matmul %237, %217, %cst_44 {dimension_numbers = #tpu.dot_dimension_numbers<[1], [0], [0], [1], [0, 0, 1, 1], [], []>} : vector<8x32xf32>, vector<32x128xf32>, vector<8x128xf32> -> vector<8x128xf32>
    %240 = arith.addf %238, %239 : vector<8x128xf32>
    %241 = arith.negf %240 : vector<8x128xf32>
    %242 = math.exp %241 : vector<8x128xf32>
    %cst_45 = arith.constant 1.000000e+00 : f32
    %243 = vector.broadcast %cst_45 : f32 to vector<8x128xf32>
    %244 = arith.addf %243, %242 : vector<8x128xf32>
    %245 = arith.divf %243, %244 : vector<8x128xf32>
    %246 = vector.extract_strided_slice %240 {offsets = [0, 64], sizes = [8, 32], strides = [1, 1]} : vector<8x128xf32> to vector<8x32xf32>
    %247 = math.tanh %246 : vector<8x32xf32>
    %248 = vector.extract_strided_slice %245 {offsets = [0, 0], sizes = [8, 32], strides = [1, 1]} : vector<8x128xf32> to vector<8x32xf32>
    %249 = vector.extract_strided_slice %245 {offsets = [0, 32], sizes = [8, 32], strides = [1, 1]} : vector<8x128xf32> to vector<8x32xf32>
    %250 = vector.extract_strided_slice %245 {offsets = [0, 96], sizes = [8, 32], strides = [1, 1]} : vector<8x128xf32> to vector<8x32xf32>
    %251 = arith.mulf %249, %235 : vector<8x32xf32>
    %252 = arith.mulf %248, %247 : vector<8x32xf32>
    %253 = arith.addf %251, %252 : vector<8x32xf32>
    %254 = math.tanh %253 : vector<8x32xf32>
    %255 = arith.mulf %250, %254 : vector<8x32xf32>
    %256 = vector.extract_strided_slice %216 {offsets = [16, 0], sizes = [8, 128], strides = [1, 1]} : vector<64x256xf32> to vector<8x128xf32>
    %cst_46 = arith.constant dense<0.000000e+00> : vector<8x128xf32>
    %257 = tpu.matmul %255, %217, %cst_46 {dimension_numbers = #tpu.dot_dimension_numbers<[1], [0], [0], [1], [0, 0, 1, 1], [], []>} : vector<8x32xf32>, vector<32x128xf32>, vector<8x128xf32> -> vector<8x128xf32>
    %258 = arith.addf %256, %257 : vector<8x128xf32>
    %259 = arith.negf %258 : vector<8x128xf32>
    %260 = math.exp %259 : vector<8x128xf32>
    %cst_47 = arith.constant 1.000000e+00 : f32
    %261 = vector.broadcast %cst_47 : f32 to vector<8x128xf32>
    %262 = arith.addf %261, %260 : vector<8x128xf32>
    %263 = arith.divf %261, %262 : vector<8x128xf32>
    %264 = vector.extract_strided_slice %258 {offsets = [0, 64], sizes = [8, 32], strides = [1, 1]} : vector<8x128xf32> to vector<8x32xf32>
    %265 = math.tanh %264 : vector<8x32xf32>
    %266 = vector.extract_strided_slice %263 {offsets = [0, 0], sizes = [8, 32], strides = [1, 1]} : vector<8x128xf32> to vector<8x32xf32>
    %267 = vector.extract_strided_slice %263 {offsets = [0, 32], sizes = [8, 32], strides = [1, 1]} : vector<8x128xf32> to vector<8x32xf32>
    %268 = vector.extract_strided_slice %263 {offsets = [0, 96], sizes = [8, 32], strides = [1, 1]} : vector<8x128xf32> to vector<8x32xf32>
    %269 = arith.mulf %267, %253 : vector<8x32xf32>
    %270 = arith.mulf %266, %265 : vector<8x32xf32>
    %271 = arith.addf %269, %270 : vector<8x32xf32>
    %272 = math.tanh %271 : vector<8x32xf32>
    %273 = arith.mulf %268, %272 : vector<8x32xf32>
    %274 = vector.extract_strided_slice %216 {offsets = [24, 0], sizes = [8, 128], strides = [1, 1]} : vector<64x256xf32> to vector<8x128xf32>
    %cst_48 = arith.constant dense<0.000000e+00> : vector<8x128xf32>
    %275 = tpu.matmul %273, %217, %cst_48 {dimension_numbers = #tpu.dot_dimension_numbers<[1], [0], [0], [1], [0, 0, 1, 1], [], []>} : vector<8x32xf32>, vector<32x128xf32>, vector<8x128xf32> -> vector<8x128xf32>
    %276 = arith.addf %274, %275 : vector<8x128xf32>
    %277 = arith.negf %276 : vector<8x128xf32>
    %278 = math.exp %277 : vector<8x128xf32>
    %cst_49 = arith.constant 1.000000e+00 : f32
    %279 = vector.broadcast %cst_49 : f32 to vector<8x128xf32>
    %280 = arith.addf %279, %278 : vector<8x128xf32>
    %281 = arith.divf %279, %280 : vector<8x128xf32>
    %282 = vector.extract_strided_slice %276 {offsets = [0, 64], sizes = [8, 32], strides = [1, 1]} : vector<8x128xf32> to vector<8x32xf32>
    %283 = math.tanh %282 : vector<8x32xf32>
    %284 = vector.extract_strided_slice %281 {offsets = [0, 0], sizes = [8, 32], strides = [1, 1]} : vector<8x128xf32> to vector<8x32xf32>
    %285 = vector.extract_strided_slice %281 {offsets = [0, 32], sizes = [8, 32], strides = [1, 1]} : vector<8x128xf32> to vector<8x32xf32>
    %286 = vector.extract_strided_slice %281 {offsets = [0, 96], sizes = [8, 32], strides = [1, 1]} : vector<8x128xf32> to vector<8x32xf32>
    %287 = arith.mulf %285, %271 : vector<8x32xf32>
    %288 = arith.mulf %284, %283 : vector<8x32xf32>
    %289 = arith.addf %287, %288 : vector<8x32xf32>
    %290 = math.tanh %289 : vector<8x32xf32>
    %291 = arith.mulf %286, %290 : vector<8x32xf32>
    %292 = vector.extract_strided_slice %216 {offsets = [32, 0], sizes = [8, 128], strides = [1, 1]} : vector<64x256xf32> to vector<8x128xf32>
    %cst_50 = arith.constant dense<0.000000e+00> : vector<8x128xf32>
    %293 = tpu.matmul %291, %217, %cst_50 {dimension_numbers = #tpu.dot_dimension_numbers<[1], [0], [0], [1], [0, 0, 1, 1], [], []>} : vector<8x32xf32>, vector<32x128xf32>, vector<8x128xf32> -> vector<8x128xf32>
    %294 = arith.addf %292, %293 : vector<8x128xf32>
    %295 = arith.negf %294 : vector<8x128xf32>
    %296 = math.exp %295 : vector<8x128xf32>
    %cst_51 = arith.constant 1.000000e+00 : f32
    %297 = vector.broadcast %cst_51 : f32 to vector<8x128xf32>
    %298 = arith.addf %297, %296 : vector<8x128xf32>
    %299 = arith.divf %297, %298 : vector<8x128xf32>
    %300 = vector.extract_strided_slice %294 {offsets = [0, 64], sizes = [8, 32], strides = [1, 1]} : vector<8x128xf32> to vector<8x32xf32>
    %301 = math.tanh %300 : vector<8x32xf32>
    %302 = vector.extract_strided_slice %299 {offsets = [0, 0], sizes = [8, 32], strides = [1, 1]} : vector<8x128xf32> to vector<8x32xf32>
    %303 = vector.extract_strided_slice %299 {offsets = [0, 32], sizes = [8, 32], strides = [1, 1]} : vector<8x128xf32> to vector<8x32xf32>
    %304 = vector.extract_strided_slice %299 {offsets = [0, 96], sizes = [8, 32], strides = [1, 1]} : vector<8x128xf32> to vector<8x32xf32>
    %305 = arith.mulf %303, %289 : vector<8x32xf32>
    %306 = arith.mulf %302, %301 : vector<8x32xf32>
    %307 = arith.addf %305, %306 : vector<8x32xf32>
    %308 = math.tanh %307 : vector<8x32xf32>
    %309 = arith.mulf %304, %308 : vector<8x32xf32>
    %310 = vector.extract_strided_slice %216 {offsets = [40, 0], sizes = [8, 128], strides = [1, 1]} : vector<64x256xf32> to vector<8x128xf32>
    %cst_52 = arith.constant dense<0.000000e+00> : vector<8x128xf32>
    %311 = tpu.matmul %309, %217, %cst_52 {dimension_numbers = #tpu.dot_dimension_numbers<[1], [0], [0], [1], [0, 0, 1, 1], [], []>} : vector<8x32xf32>, vector<32x128xf32>, vector<8x128xf32> -> vector<8x128xf32>
    %312 = arith.addf %310, %311 : vector<8x128xf32>
    %313 = arith.negf %312 : vector<8x128xf32>
    %314 = math.exp %313 : vector<8x128xf32>
    %cst_53 = arith.constant 1.000000e+00 : f32
    %315 = vector.broadcast %cst_53 : f32 to vector<8x128xf32>
    %316 = arith.addf %315, %314 : vector<8x128xf32>
    %317 = arith.divf %315, %316 : vector<8x128xf32>
    %318 = vector.extract_strided_slice %312 {offsets = [0, 64], sizes = [8, 32], strides = [1, 1]} : vector<8x128xf32> to vector<8x32xf32>
    %319 = math.tanh %318 : vector<8x32xf32>
    %320 = vector.extract_strided_slice %317 {offsets = [0, 0], sizes = [8, 32], strides = [1, 1]} : vector<8x128xf32> to vector<8x32xf32>
    %321 = vector.extract_strided_slice %317 {offsets = [0, 32], sizes = [8, 32], strides = [1, 1]} : vector<8x128xf32> to vector<8x32xf32>
    %322 = vector.extract_strided_slice %317 {offsets = [0, 96], sizes = [8, 32], strides = [1, 1]} : vector<8x128xf32> to vector<8x32xf32>
    %323 = arith.mulf %321, %307 : vector<8x32xf32>
    %324 = arith.mulf %320, %319 : vector<8x32xf32>
    %325 = arith.addf %323, %324 : vector<8x32xf32>
    %326 = math.tanh %325 : vector<8x32xf32>
    %327 = arith.mulf %322, %326 : vector<8x32xf32>
    %328 = vector.extract_strided_slice %216 {offsets = [48, 0], sizes = [8, 128], strides = [1, 1]} : vector<64x256xf32> to vector<8x128xf32>
    %cst_54 = arith.constant dense<0.000000e+00> : vector<8x128xf32>
    %329 = tpu.matmul %327, %217, %cst_54 {dimension_numbers = #tpu.dot_dimension_numbers<[1], [0], [0], [1], [0, 0, 1, 1], [], []>} : vector<8x32xf32>, vector<32x128xf32>, vector<8x128xf32> -> vector<8x128xf32>
    %330 = arith.addf %328, %329 : vector<8x128xf32>
    %331 = arith.negf %330 : vector<8x128xf32>
    %332 = math.exp %331 : vector<8x128xf32>
    %cst_55 = arith.constant 1.000000e+00 : f32
    %333 = vector.broadcast %cst_55 : f32 to vector<8x128xf32>
    %334 = arith.addf %333, %332 : vector<8x128xf32>
    %335 = arith.divf %333, %334 : vector<8x128xf32>
    %336 = vector.extract_strided_slice %330 {offsets = [0, 64], sizes = [8, 32], strides = [1, 1]} : vector<8x128xf32> to vector<8x32xf32>
    %337 = math.tanh %336 : vector<8x32xf32>
    %338 = vector.extract_strided_slice %335 {offsets = [0, 0], sizes = [8, 32], strides = [1, 1]} : vector<8x128xf32> to vector<8x32xf32>
    %339 = vector.extract_strided_slice %335 {offsets = [0, 32], sizes = [8, 32], strides = [1, 1]} : vector<8x128xf32> to vector<8x32xf32>
    %340 = vector.extract_strided_slice %335 {offsets = [0, 96], sizes = [8, 32], strides = [1, 1]} : vector<8x128xf32> to vector<8x32xf32>
    %341 = arith.mulf %339, %325 : vector<8x32xf32>
    %342 = arith.mulf %338, %337 : vector<8x32xf32>
    %343 = arith.addf %341, %342 : vector<8x32xf32>
    %344 = math.tanh %343 : vector<8x32xf32>
    %345 = arith.mulf %340, %344 : vector<8x32xf32>
    %346 = vector.extract_strided_slice %216 {offsets = [56, 0], sizes = [8, 128], strides = [1, 1]} : vector<64x256xf32> to vector<8x128xf32>
    %cst_56 = arith.constant dense<0.000000e+00> : vector<8x128xf32>
    %347 = tpu.matmul %345, %217, %cst_56 {dimension_numbers = #tpu.dot_dimension_numbers<[1], [0], [0], [1], [0, 0, 1, 1], [], []>} : vector<8x32xf32>, vector<32x128xf32>, vector<8x128xf32> -> vector<8x128xf32>
    %348 = arith.addf %346, %347 : vector<8x128xf32>
    %349 = arith.negf %348 : vector<8x128xf32>
    %350 = math.exp %349 : vector<8x128xf32>
    %cst_57 = arith.constant 1.000000e+00 : f32
    %351 = vector.broadcast %cst_57 : f32 to vector<8x128xf32>
    %352 = arith.addf %351, %350 : vector<8x128xf32>
    %353 = arith.divf %351, %352 : vector<8x128xf32>
    %354 = vector.extract_strided_slice %348 {offsets = [0, 64], sizes = [8, 32], strides = [1, 1]} : vector<8x128xf32> to vector<8x32xf32>
    %355 = math.tanh %354 : vector<8x32xf32>
    %356 = vector.extract_strided_slice %353 {offsets = [0, 0], sizes = [8, 32], strides = [1, 1]} : vector<8x128xf32> to vector<8x32xf32>
    %357 = vector.extract_strided_slice %353 {offsets = [0, 32], sizes = [8, 32], strides = [1, 1]} : vector<8x128xf32> to vector<8x32xf32>
    %358 = vector.extract_strided_slice %353 {offsets = [0, 96], sizes = [8, 32], strides = [1, 1]} : vector<8x128xf32> to vector<8x32xf32>
    %359 = arith.mulf %357, %343 : vector<8x32xf32>
    %360 = arith.mulf %356, %355 : vector<8x32xf32>
    %361 = arith.addf %359, %360 : vector<8x32xf32>
    %362 = math.tanh %361 : vector<8x32xf32>
    %363 = arith.mulf %358, %362 : vector<8x32xf32>
    %364 = vector.extract_strided_slice %216 {offsets = [56, 128], sizes = [8, 128], strides = [1, 1]} : vector<64x256xf32> to vector<8x128xf32>
    %365 = arith.negf %364 : vector<8x128xf32>
    %366 = math.exp %365 : vector<8x128xf32>
    %cst_58 = arith.constant 1.000000e+00 : f32
    %367 = vector.broadcast %cst_58 : f32 to vector<8x128xf32>
    %368 = arith.addf %367, %366 : vector<8x128xf32>
    %369 = arith.divf %367, %368 : vector<8x128xf32>
    %370 = vector.extract_strided_slice %364 {offsets = [0, 64], sizes = [8, 32], strides = [1, 1]} : vector<8x128xf32> to vector<8x32xf32>
    %371 = math.tanh %370 : vector<8x32xf32>
    %372 = vector.extract_strided_slice %369 {offsets = [0, 0], sizes = [8, 32], strides = [1, 1]} : vector<8x128xf32> to vector<8x32xf32>
    %373 = vector.extract_strided_slice %369 {offsets = [0, 96], sizes = [8, 32], strides = [1, 1]} : vector<8x128xf32> to vector<8x32xf32>
    %374 = arith.mulf %372, %371 : vector<8x32xf32>
    %375 = math.tanh %374 : vector<8x32xf32>
    %376 = arith.mulf %373, %375 : vector<8x32xf32>
    %c0_59 = arith.constant 0 : index
    %c0_60 = arith.constant 0 : index
    %377 = vector.load %arg8[%c0_59, %c0_60] : memref<64x32xf32, #tpu.memory_space<vmem>>, vector<32x32xf32>
    %cst_61 = arith.constant dense<0.000000e+00> : vector<8x32xf32>
    %378 = tpu.matmul %363, %377, %cst_61 {dimension_numbers = #tpu.dot_dimension_numbers<[1], [0], [0], [1], [0, 0, 1, 1], [], []>} : vector<8x32xf32>, vector<32x32xf32>, vector<8x32xf32> -> vector<8x32xf32>
    %c32_62 = arith.constant 32 : index
    %c0_63 = arith.constant 0 : index
    %379 = vector.load %arg8[%c32_62, %c0_63] : memref<64x32xf32, #tpu.memory_space<vmem>>, vector<32x32xf32>
    %cst_64 = arith.constant dense<0.000000e+00> : vector<8x32xf32>
    %380 = tpu.matmul %376, %379, %cst_64 {dimension_numbers = #tpu.dot_dimension_numbers<[1], [0], [0], [1], [0, 0, 1, 1], [], []>} : vector<8x32xf32>, vector<32x32xf32>, vector<8x32xf32> -> vector<8x32xf32>
    %381 = arith.addf %378, %380 : vector<8x32xf32>
    %c0_65 = arith.constant 0 : index
    %c0_66 = arith.constant 0 : index
    %382 = vector.load %arg9[%c0_65, %c0_66] : memref<1x32xf32, #tpu.memory_space<vmem>>, vector<1x32xf32>
    %383 = vector.broadcast %382 : vector<1x32xf32> to vector<8x32xf32>
    %384 = arith.addf %381, %383 : vector<8x32xf32>
    %385 = vector.extract_strided_slice %384 {offsets = [0, 0], sizes = [2, 32], strides = [1, 1]} : vector<8x32xf32> to vector<2x32xf32>
    %c0_67 = arith.constant 0 : index
    %c0_68 = arith.constant 0 : index
    %386 = vector.load %arg10[%c0_67, %c0_68] : memref<2x32xf32, #tpu.memory_space<vmem>>, vector<2x32xf32>
    tpu.vector_store %arg10[%c0_67, %c0_68], %385 {strides = array<i32>} : memref<2x32xf32, #tpu.memory_space<vmem>>, vector<2x32xf32>,
    return
  }
}

</mosaic_0001>

<bundles_post_ra>
// kernel: lstm_model_forward.1
= control target key start
LH: loop header
LB: loop body
LE: loop exit
PB: predicated region body
PF: predicated region fallthrough
CT: control target
= control target key end

     0   :  { %15 = vsyncpa [#allocation3], 0  ;;  %s3175_s0 = inlined_call_operand.vmem [shape: s32[64,1], index: 0, kind: input, shape index: {}]   ;;  %s3176_s1 = inlined_call_operand.vmem [shape: f32[128,32], index: 1, kind: input, shape index: {}]   ;;  %s3177_s2 = inlined_call_operand.vmem [shape: f32[32,256], index: 2, kind: input, shape index: {}]   ;;  %s3178_s3 = inlined_call_operand.vmem [shape: f32[64,256], index: 3, kind: input, shape index: {}]   ;;  %s3179_s4 = inlined_call_operand.vmem [shape: f32[1,256], index: 4, kind: input, shape index: {}]   ;;  %s3180_s5 = inlined_call_operand.hbm [shape: f32[64,256], index: 5, kind: input, shape index: {}]   ;;  %s3181_s6 = inlined_call_operand.vmem [shape: f32[32,128], index: 6, kind: input, shape index: {}]   ;;  %s3182_s7 = inlined_call_operand.vmem [shape: f32[1,256], index: 7, kind: input, shape index: {}]   ;;  %s3183_s8 = inlined_call_operand.vmem [shape: f32[64,32], index: 8, kind: input, shape index: {}]   ;;  %s3184_s9 = inlined_call_operand.vmem [shape: f32[1,32], index: 9, kind: input, shape index: {}]   ;;  %s3185_s10 = inlined_call_operand.hbm [shape: f32[2,32], index: 10, kind: output, shape index: {}]  }
   0x1   :  { %16 = vsyncpa [#allocation4], 0  ;;  %s31_s15 = sshll.u32 %s3180_s5, 4  ;;  %s2306_s16 = smov [#allocation2]   ;;  %s32_s15 = int_to_ptr.hbm [resolvable:$true] %s31_s15 }
   0x2   :  { %s33_s17 = sshll.u32 %s2306_s16, 4  ;;  %s2307_s18 = smov 256   ;;  %s34_s17 = int_to_ptr.vmem [resolvable:$true] %s33_s17 }
   0x3   :  { %s2308_s19 = smov 16  }
   0x4   :  { %39 = dma.hbm_to_vmem [thread:$0]  %s32_s15, 2048, %s34_s17, [#allocation3], %s2307_s18, %s2307_s18, %s2308_s19  }
   0x5   :  { %2302 = dma.done.wait [#allocation3], 2048  }
   0x6   :  { %2303 = vsyncadd [#allocation3], 4294965248  ;;  %v2309_v0 = vmov 0   ;;  %v54_v1 = vld [vmem:[%s3175_s0 + $0x10] sm:$0xff]  ;;  %v52_v2 = vld [vmem:[%s3175_s0] sm:$0xff]  ;;  %v60_v25 = vlaneseq  ;;  %v2310_v28 = vmov 1.0  }
   0x7   :  { %2083 = vset.pattern.permute.xlu1 %v2309_v0  ;;  %2082 = vset.pattern.permute.xlu0 %v2309_v0  ;;  %v56_v3 = vld [vmem:[%s3175_s0 + $0x20] sm:$0xff]  ;;  %v125_v4 = vld [vmem:[%s3176_s1 + $0x78] sm:$0xff]  ;;  %v124_v5 = vld [vmem:[%s3176_s1 + $0x70] sm:$0xff]  ;;  %vm181_vm8 = vcmask 261120   ;;  %v3186_v59 = vmov 0.0   ;;  %s2313_s24 = smov 32  }
   0x8   :  { %2084 = vset.pattern.permute.xlu2 %v2309_v0  ;;  %69 = vperm.xlu1 %2083, %v54_v1   ;;  %v123_v6 = vld [vmem:[%s3176_s1 + $0x68] sm:$0xff]  ;;  %v55_v7 = vld [vmem:[%s3175_s0 + $0x18] sm:$0xff]  ;;  %v122_v9 = vld [vmem:[%s3176_s1 + $0x60] sm:$0xff]  ;;  %v2446_v26 = vand.u32 127, %v60_v25  ;;  %s2315_s26 = smov [#allocation5]   ;;  %s1950_s30 = sshll.u32 %s3185_s10, 4  ;;  %s1951_s30 = int_to_ptr.hbm [resolvable:$true] %s1950_s30 }
   0x9   :  { %63 = vperm.xlu0 %2082, %v52_v2   ;;  %75 = vperm.xlu2 %2084, %v56_v3   ;;  %v53_v8 = vld [vmem:[%s3175_s0 + $0x8] sm:$0xff]  ;;  %v121_v11 = vld [vmem:[%s3176_s1 + $0x58] sm:$0xff]  ;;  %v120_v12 = vld [vmem:[%s3176_s1 + $0x50] sm:$0xff]  ;;  %s1948_s27 = sshll.u32 %s2315_s26, 4  ;;  %s1949_s27 = int_to_ptr.vmem [resolvable:$true] %s1948_s27 }
   0xa   :  { %126 = vmatpush.msra.mxu0 %v125_v4  ;;  %v57_v10 = vld [vmem:[%s3175_s0 + $0x28] sm:$0xff]  ;;  %v59_v14 = vld [vmem:[%s3175_s0 + $0x38] sm:$0xff]  ;;  %v58_v15 = vld [vmem:[%s3175_s0 + $0x30] sm:$0xff] }
   0xb   :  { %v119_v13 = vld [vmem:[%s3176_s1 + $0x48] sm:$0xff]  ;;  %v118_v16 = vld [vmem:[%s3176_s1 + $0x40] sm:$0xff]  ;;  %v117_v17 = vld [vmem:[%s3176_s1 + $0x38] sm:$0xff] }
   0xc   :  { %127 = vmatpush.msra.mxu0 %v124_v5  ;;  %v116_v18 = vld [vmem:[%s3176_s1 + $0x30] sm:$0xff]  ;;  %v115_v19 = vld [vmem:[%s3176_s1 + $0x28] sm:$0xff]  ;;  %v114_v20 = vld [vmem:[%s3176_s1 + $0x20] sm:$0xff] }
   0xd   :  { %v113_v21 = vld [vmem:[%s3176_s1 + $0x18] sm:$0xff]  ;;  %v112_v22 = vld [vmem:[%s3176_s1 + $0x10] sm:$0xff]  ;;  %v111_v23 = vld [vmem:[%s3176_s1 + $0x8] sm:$0xff] }
   0xe   :  { %128 = vmatpush.msra.mxu0 %v123_v6  ;;  %v110_v24 = vld [vmem:[%s3176_s1] sm:$0xff]  ;;  %v173_v32 = vld [vmem:[%s3177_s2 + $0x30] sm:$0xff]  ;;  %v174_v33 = vld [vmem:[%s3177_s2 + $0x38] sm:$0xff] }
   0xf   :  { %v171_v34 = vld [vmem:[%s3177_s2 + $0x20] sm:$0xff]  ;;  %218 = vmatpush.msra.mxu1 %v173_v32  ;;  %259 = vmatpush.msra.mxu2 %v174_v33  ;;  %v172_v35 = vld [vmem:[%s3177_s2 + $0x28] sm:$0xff]  ;;  %v169_v37 = vld [vmem:[%s3177_s2 + $0x10] sm:$0xff] }
  0x10   :  { %72 = vperm.xlu1 %2083, %v55_v7   ;;  %129 = vmatpush.msra.mxu0 %v122_v9  ;;  %v170_v38 = vld [vmem:[%s3177_s2 + $0x18] sm:$0xff]  ;;  %v167_v42 = vld [vmem:[%s3177_s2] sm:$0xff]  ;;  %v168_v43 = vld [vmem:[%s3177_s2 + $0x8] sm:$0xff] }
  0x11   :  { %66 = vperm.xlu0 %2082, %v53_v8   ;;  %78 = vperm.xlu2 %2084, %v57_v10   ;;  %v2483_v44 = vld [vmem:[%s3178_s3 + $0x70] sm:$0xff]  ;;  %v2490_v45 = vld [vmem:[%s3178_s3 + $0x60] sm:$0xff]  ;;  %v2539_v54 = vld [vmem:[%s3178_s3 + $0x78] sm:$0xff] }
  0x12   :  { %130 = vmatpush.msra.mxu0 %v121_v11  ;;  %219 = vmatpush.msra.mxu1 %v171_v34  ;;  %v2499_v47 = vld [vmem:[%s3178_s3 + $0x50] sm:$0xff]  ;;  %v2504_v48 = vld [vmem:[%s3178_s3 + $0x40] sm:$0xff]  ;;  %v2546_v55 = vld [vmem:[%s3178_s3 + $0x68] sm:$0xff] }
  0x13   :  { %260 = vmatpush.msra.mxu2 %v172_v35  ;;  %363 = vmatpush.msra.mxu3 %v2483_v44  ;;  %v2511_v49 = vld [vmem:[%s3178_s3 + $0x30] sm:$0xff]  ;;  %v2520_v50 = vld [vmem:[%s3178_s3 + $0x20] sm:$0xff]  ;;  %v2560_v57 = vld [vmem:[%s3178_s3 + $0x58] sm:$0xff] }
  0x14   :  { %131 = vmatpush.msra.mxu0 %v120_v12  ;;  %220 = vmatpush.msra.mxu1 %v169_v37  ;;  %v2529_v52 = vld [vmem:[%s3178_s3 + $0x10] sm:$0xff]  ;;  %v2534_v53 = vld [vmem:[%s3178_s3] sm:$0xff]  ;;  %v2568_v58 = vld [vmem:[%s3178_s3 + $0x48] sm:$0xff] }
  0x15   :  { %261 = vmatpush.msra.mxu2 %v170_v38  ;;  %364 = vmatpush.msra.mxu3 %v2490_v45  ;;  %v2576_v60 = vld [vmem:[%s3178_s3 + $0x38] sm:$0xff]  ;;  %v2584_v61 = vld [vmem:[%s3178_s3 + $0x28] sm:$0xff]  ;;  %v175_v6 = vld [vmem:[%s3179_s4] sm:$0x3]  ;;  %s2312_s4 = smov 64  }
  0x16   :  { %132 = vmatpush.msra.mxu0 %v119_v13  ;;  %221 = vmatpush.msra.mxu1 %v167_v42  ;;  %v2596_v63 = vld [vmem:[%s3178_s3 + $0x18] sm:$0xff]  ;;  %v2604_v0 = vld [vmem:[%s3178_s3 + $0x8] sm:$0xff]  ;;  %v177_v8 = vperm.slane %v175_v6, 0  ;;  %v178_v11 = vperm.slane %v175_v6, 1 }
  0x17   :  { %262 = vmatpush.msra.mxu2 %v168_v43  ;;  %365 = vmatpush.msra.mxu3 %v2499_v47 }
  0x18   :  { %84 = vperm.xlu1 %2083, %v59_v14   ;;  %133 = vmatpush.msra.mxu0 %v118_v16 }
  0x19   :  { %81 = vperm.xlu0 %2082, %v58_v15   ;;  %553 = vmatpush.msrb.mxu1 %v2483_v44 }
  0x1a   :  { %134 = vmatpush.msra.mxu0 %v117_v17  ;;  %366 = vmatpush.msra.mxu3 %v2504_v48 }
  0x1b   :  { %554 = vmatpush.msrb.mxu1 %v2490_v45  ;;  %573 = vmatpush.msrb.mxu2 %v2539_v54 }
  0x1c   :  { %135 = vmatpush.msra.mxu0 %v116_v18  ;;  %367 = vmatpush.msra.mxu3 %v2511_v49 }
  0x1d   :  { %555 = vmatpush.msrb.mxu1 %v2499_v47  ;;  %574 = vmatpush.msrb.mxu2 %v2546_v55 }
  0x1e   :  { %136 = vmatpush.msra.mxu0 %v115_v19  ;;  %368 = vmatpush.msra.mxu3 %v2520_v50 }
  0x1f   :  { %556 = vmatpush.msrb.mxu1 %v2504_v48  ;;  %575 = vmatpush.msrb.mxu2 %v2560_v57 }
  0x20   :  { %137 = vmatpush.msra.mxu0 %v114_v20  ;;  %369 = vmatpush.msra.mxu3 %v2529_v52  ;;  %v293_v20 = vand.u32 63, %v2446_v26 }
  0x21   :  { %557 = vmatpush.msrb.mxu1 %v2511_v49  ;;  %576 = vmatpush.msrb.mxu2 %v2568_v58 }
  0x22   :  { %138 = vmatpush.msra.mxu0 %v113_v21  ;;  %370 = vmatpush.msra.mxu3 %v2534_v53  ;;  %vm2675_vm9 = vcmp.lt.s32.totalorder %v293_v20, 32 }
  0x23   :  { %558 = vmatpush.msrb.mxu1 %v2520_v50  ;;  %371 = vmatmul.f32.vlgmr.msra.gmra.mxu3 %v3186_v59 }
  0x24   :  { %139 = vmatpush.msra.mxu0 %v112_v22  ;;  %383 = vmatpush.msrb.mxu3 %v2539_v54  ;;  %v288_v22 = vadd.s32 128, %v2446_v26 }
  0x25   :  { %559 = vmatpush.msrb.mxu1 %v2529_v52  ;;  %577 = vmatpush.msrb.mxu2 %v2576_v60 }
  0x26   :  { %140 = vmatpush.msra.mxu0 %v111_v23  ;;  %384 = vmatpush.msrb.mxu3 %v2546_v55 }
  0x27   :  { %560 = vmatpush.msrb.mxu1 %v2534_v53  ;;  %578 = vmatpush.msrb.mxu2 %v2584_v61 }
  0x28   :  { %141 = vmatpush.msra.mxu0 %v110_v24  ;;  %385 = vmatpush.msrb.mxu3 %v2560_v57 }
  0x29   :  { %579 = vmatpush.msrb.mxu2 %v2596_v63 }
  0x2a   :  { %763 = vmatpush.msrb.mxu0 %v2539_v54  ;;  %386 = vmatpush.msrb.mxu3 %v2568_v58 }
  0x2b   :  { %580 = vmatpush.msrb.mxu2 %v2604_v0 }
  0x2c   :  { %764 = vmatpush.msrb.mxu0 %v2546_v55  ;;  %387 = vmatpush.msrb.mxu3 %v2576_v60 }
  0x2e   :  { %765 = vmatpush.msrb.mxu0 %v2560_v57  ;;  %388 = vmatpush.msrb.mxu3 %v2584_v61 }
  0x30   :  { %766 = vmatpush.msrb.mxu0 %v2568_v58  ;;  %389 = vmatpush.msrb.mxu3 %v2596_v63 }
  0x32   :  { %767 = vmatpush.msrb.mxu0 %v2576_v60  ;;  %390 = vmatpush.msrb.mxu3 %v2604_v0 }
  0x33   :  { %391 = vmatmul.f32.vlgmr.msrb.gmra.mxu3 %v3186_v59 }
  0x34   :  { %458 = vmatpush.msra.mxu3 %v2483_v44  ;;  %768 = vmatpush.msrb.mxu0 %v2584_v61 }
  0x36   :  { %459 = vmatpush.msra.mxu3 %v2490_v45  ;;  %769 = vmatpush.msrb.mxu0 %v2596_v63 }
  0x38   :  { %460 = vmatpush.msra.mxu3 %v2499_v47  ;;  %770 = vmatpush.msrb.mxu0 %v2604_v0 }
  0x3a   :  { %461 = vmatpush.msra.mxu3 %v2504_v48 }
  0x3c   :  { %462 = vmatpush.msra.mxu3 %v2511_v49 }
  0x3e   :  { %463 = vmatpush.msra.mxu3 %v2520_v50 }
  0x40   :  { %464 = vmatpush.msra.mxu3 %v2529_v52 }
  0x42   :  { %465 = vmatpush.msra.mxu3 %v2534_v53 }
  0x44   :  { %478 = vmatpush.msrb.mxu3 %v2539_v54 }
  0x46   :  { %479 = vmatpush.msrb.mxu3 %v2546_v55 }
  0x48   :  { %480 = vmatpush.msrb.mxu3 %v2560_v57 }
  0x4a   :  { %481 = vmatpush.msrb.mxu3 %v2568_v58 }
  0x4c   :  { %482 = vmatpush.msrb.mxu3 %v2576_v60 }
  0x4e   :  { %483 = vmatpush.msrb.mxu3 %v2584_v61 }
  0x50   :  { %484 = vmatpush.msrb.mxu3 %v2596_v63 }
  0x52   :  { %485 = vmatpush.msrb.mxu3 %v2604_v0 }
  0x63   :  { %v76_v36 = vpop.permute.xlu2 %75 }
  0x64   :  { %vm90_vm4 = vcmp.eq.s32.totalorder %v2446_v26, %v76_v36 }
  0x6b   :  { %v79_v39 = vpop.permute.xlu2 %78 }
  0x6c   :  { %vm91_vm5 = vcmp.eq.s32.totalorder %v2446_v26, %v79_v39 }
  0x7a   :  { %v70_v30 = vpop.permute.xlu1 %69 }
  0x7b   :  { %v64_v27 = vpop.permute.xlu0 %63  ;;  %vm88_vm2 = vcmp.eq.s32.totalorder %v2446_v26, %v70_v30 }
  0x7c   :  { %vm86_vm0 = vcmp.eq.s32.totalorder %v2446_v26, %v64_v27 }
  0x7d   :  { %1968 = vmatmul.msk.f32.vlgmr.msra.gmra.mxu0 %vm86_vm0, %v2310_v28 }
  0x7e   :  { %953 = vmatpush.msra.mxu0 %v2539_v54 }
  0x80   :  { %954 = vmatpush.msra.mxu0 %v2546_v55 }
  0x82   :  { %v73_v31 = vpop.permute.xlu1 %72  ;;  %955 = vmatpush.msra.mxu0 %v2560_v57 }
  0x83   :  { %v67_v29 = vpop.permute.xlu0 %66  ;;  %vm89_vm3 = vcmp.eq.s32.totalorder %v2446_v26, %v73_v31 }
  0x84   :  { %vm87_vm1 = vcmp.eq.s32.totalorder %v2446_v26, %v67_v29  ;;  %956 = vmatpush.msra.mxu0 %v2568_v58 }
  0x85   :  { %1969 = vmatmul.msk.f32.gmra.mxu0 %vm87_vm1, %v2310_v28 }
  0x86   :  { %957 = vmatpush.msra.mxu0 %v2576_v60 }
  0x88   :  { %958 = vmatpush.msra.mxu0 %v2584_v61 }
  0x8a   :  { %v85_v41 = vpop.permute.xlu1 %84  ;;  %959 = vmatpush.msra.mxu0 %v2596_v63 }
  0x8b   :  { %v82_v40 = vpop.permute.xlu0 %81  ;;  %vm93_vm7 = vcmp.eq.s32.totalorder %v2446_v26, %v85_v41 }
  0x8c   :  { %vm92_vm6 = vcmp.eq.s32.totalorder %v2446_v26, %v82_v40  ;;  %960 = vmatpush.msra.mxu0 %v2604_v0 }
  0x8d   :  { %1970 = vmatmul.msk.f32.gmra.mxu0 %vm88_vm2, %v2310_v28 }
  0x95   :  { %1971 = vmatmul.msk.f32.gmra.mxu0 %vm89_vm3, %v2310_v28  ;;  %vm351_vm3 = vcmask 523264  }
  0x9d   :  { %1972 = vmatmul.msk.f32.gmra.mxu0 %vm90_vm4, %v2310_v28 }
  0xa5   :  { %1973 = vmatmul.msk.f32.gmra.mxu0 %vm91_vm5, %v2310_v28 }
  0xad   :  { %1974 = vmatmul.msk.f32.gmra.mxu0 %vm92_vm6, %v2310_v28 }
  0xb5   :  { %1975 = vmatmul.msk.f32.gmra.mxu0 %vm93_vm7, %v2310_v28  ;;  %v300_v28 = vand.u32 63, %v288_v22 }
  0xb7   :  { %vm2689_vm10 = vcmp.lt.s32.totalorder %v300_v28, 32 }
  0xfa   :  { %v143_v46 = vpop.f32.mrf.mxu0 }
  0xfb   :  { %1976 = vmatmul.msk.f32.vlgmr.msra.gmra.mxu1 %vm181_vm8, %v143_v46  ;;  %1984 = vmatmul.msk.f32.vlgmr.msra.gmra.mxu2 %vm181_vm8, %v143_v46 }
  0xfc   :  { %668 = vmatpush.msra.mxu1 %v2539_v54  ;;  %743 = vmatpush.msra.mxu2 %v2483_v44 }
  0xfe   :  { %669 = vmatpush.msra.mxu1 %v2546_v55  ;;  %744 = vmatpush.msra.mxu2 %v2490_v45 }
 0x100   :  { %670 = vmatpush.msra.mxu1 %v2560_v57  ;;  %745 = vmatpush.msra.mxu2 %v2499_v47 }
 0x102   :  { %v146_v51 = vpop.f32.mrf.mxu0  ;;  %671 = vmatpush.msra.mxu1 %v2568_v58  ;;  %746 = vmatpush.msra.mxu2 %v2504_v48 }
 0x103   :  { %1977 = vmatmul.msk.f32.gmra.mxu1 %vm181_vm8, %v146_v51  ;;  %1985 = vmatmul.msk.f32.gmra.mxu2 %vm181_vm8, %v146_v51 }
 0x104   :  { %672 = vmatpush.msra.mxu1 %v2576_v60  ;;  %747 = vmatpush.msra.mxu2 %v2511_v49 }
 0x106   :  { %673 = vmatpush.msra.mxu1 %v2584_v61  ;;  %748 = vmatpush.msra.mxu2 %v2520_v50 }
 0x108   :  { %674 = vmatpush.msra.mxu1 %v2596_v63  ;;  %749 = vmatpush.msra.mxu2 %v2529_v52 }
 0x10a   :  { %v149_v56 = vpop.f32.mrf.mxu0  ;;  %675 = vmatpush.msra.mxu1 %v2604_v0  ;;  %750 = vmatpush.msra.mxu2 %v2534_v53 }
 0x10b   :  { %1978 = vmatmul.msk.f32.gmra.mxu1 %vm181_vm8, %v149_v56  ;;  %1986 = vmatmul.msk.f32.gmra.mxu2 %vm181_vm8, %v149_v56 }
 0x112   :  { %v152_v62 = vpop.f32.mrf.mxu0 }
 0x113   :  { %1979 = vmatmul.msk.f32.gmra.mxu1 %vm181_vm8, %v152_v62  ;;  %1987 = vmatmul.msk.f32.gmra.mxu2 %vm181_vm8, %v152_v62 }
 0x11a   :  { %v155_v1 = vpop.f32.mrf.mxu0 }
 0x11b   :  { %1980 = vmatmul.msk.f32.gmra.mxu1 %vm181_vm8, %v155_v1  ;;  %1988 = vmatmul.msk.f32.gmra.mxu2 %vm181_vm8, %v155_v1 }
 0x122   :  { %v158_v2 = vpop.f32.mrf.mxu0 }
 0x123   :  { %1981 = vmatmul.msk.f32.gmra.mxu1 %vm181_vm8, %v158_v2  ;;  %1989 = vmatmul.msk.f32.gmra.mxu2 %vm181_vm8, %v158_v2 }
 0x12a   :  { %v161_v3 = vpop.f32.mrf.mxu0 }
 0x12b   :  { %1982 = vmatmul.msk.f32.gmra.mxu1 %vm181_vm8, %v161_v3  ;;  %1990 = vmatmul.msk.f32.gmra.mxu2 %vm181_vm8, %v161_v3 }
 0x132   :  { %v164_v4 = vpop.f32.mrf.mxu0 }
 0x133   :  { %1983 = vmatmul.msk.f32.gmra.mxu1 %vm181_vm8, %v164_v4  ;;  %1991 = vmatmul.msk.f32.gmra.mxu2 %vm181_vm8, %v164_v4 }
 0x178   :  { %v223_v5 = vpop.f32.mrf.mxu1 }
 0x179   :  { %v2735_v3 = vadd.f32 %v223_v5, %v177_v8 }
 0x17e   :  { %v264_v7 = vpop.f32.mrf.mxu2 }
 0x17f   :  { %v2755_v20 = vadd.f32 %v264_v7, %v178_v11 }
 0x180   :  { %v226_v9 = vpop.f32.mrf.mxu1 }
 0x181   :  { %v2661_v10 = vadd.f32 %v226_v9, %v177_v8 }
 0x186   :  { %v267_v12 = vpop.f32.mrf.mxu2 }
 0x187   :  { %v2663_v13 = vadd.f32 %v267_v12, %v178_v11 }
 0x188   :  { %v229_v14 = vpop.f32.mrf.mxu1 }
 0x189   :  { %v2665_v15 = vadd.f32 %v229_v14, %v177_v8  ;;  %v372_v14 = vpop.f32.mrf.mxu3 }
 0x18e   :  { %v270_v16 = vpop.f32.mrf.mxu2 }
 0x18f   :  { %v2667_v17 = vadd.f32 %v270_v16, %v178_v11 }
 0x190   :  { %v232_v18 = vpop.f32.mrf.mxu1 }
 0x191   :  { %v2669_v19 = vadd.f32 %v232_v18, %v177_v8 }
 0x196   :  { %v273_v21 = vpop.f32.mrf.mxu2 }
 0x197   :  { %v2673_v23 = vadd.f32 %v273_v21, %v178_v11 }
 0x198   :  { %v235_v24 = vpop.f32.mrf.mxu1 }
 0x199   :  { %v2679_v27 = vadd.f32 %v235_v24, %v177_v8 }
 0x19b   :  { %v325_v29 = vsel %vm2675_vm9, %v2669_v19, %v2679_v27  ;;  %v327_v26 = vsel %vm2675_vm9, %v2679_v27, %v2669_v19 }
 0x19e   :  { %v276_v30 = vpop.f32.mrf.mxu2 }
 0x19f   :  { %v2693_v32 = vadd.f32 %v276_v30, %v178_v11 }
 0x1a0   :  { %v238_v33 = vpop.f32.mrf.mxu1 }
 0x1a1   :  { %v2695_v34 = vadd.f32 %v238_v33, %v177_v8  ;;  %v326_v35 = vsel %vm2689_vm10, %v2673_v23, %v2693_v32  ;;  %v328_v36 = vsel %vm2689_vm10, %v2693_v32, %v2673_v23  ;;  %v392_v33 = vpop.f32.mrf.mxu3 }
 0x1a3   :  { %v323_v37 = vsel %vm2675_vm9, %v2665_v15, %v2695_v34  ;;  %v329_v38 = vsel %vm2675_vm9, %v2695_v34, %v2665_v15 }
 0x1a6   :  { %v279_v39 = vpop.f32.mrf.mxu2 }
 0x1a7   :  { %v2713_v40 = vadd.f32 %v279_v39, %v178_v11 }
 0x1a8   :  { %v241_v41 = vpop.f32.mrf.mxu1 }
 0x1a9   :  { %v2715_v42 = vadd.f32 %v241_v41, %v177_v8  ;;  %v324_v43 = vsel %vm2689_vm10, %v2667_v17, %v2713_v40  ;;  %v330_v46 = vsel %vm2689_vm10, %v2713_v40, %v2667_v17 }
 0x1ab   :  { %v321_v51 = vsel %vm2675_vm9, %v2661_v10, %v2715_v42 }
 0x1ae   :  { %v282_v62 = vpop.f32.mrf.mxu2 }
 0x1af   :  { %v2733_v1 = vadd.f32 %v282_v62, %v178_v11 }
 0x1b0   :  { %v244_v2 = vpop.f32.mrf.mxu1 }
 0x1b1   :  { %v2737_v4 = vadd.f32 %v244_v2, %v177_v8  ;;  %v322_v6 = vsel %vm2689_vm10, %v2663_v13, %v2733_v1 }
 0x1b3   :  { %v319_v12 = vsel %vm2675_vm9, %v2735_v3, %v2737_v4 }
 0x1b4   :  { %v395_v8 = vadd.f32 %v372_v14, %v319_v12 }
 0x1b6   :  { %v1992_v16 = vmul.f32 -1.442695, %v395_v8  ;;  %v285_v18 = vpop.f32.mrf.mxu2 }
 0x1b7   :  { %v2757_v21 = vadd.f32 %v285_v18, %v178_v11 }
 0x1b8   :  { %2086 = vpow2.f32 %v1992_v16 }
 0x1b9   :  { %v320_v30 = vsel %vm2689_vm10, %v2755_v20, %v2757_v21 }
 0x1ba   :  { %v396_v7 = vadd.f32 %v392_v33, %v320_v30 }
 0x1bc   :  { %v1993_v30 = vmul.f32 -1.442695, %v396_v7 }
 0x1be   :  { %v2087_v24 = vpop.eup %2086 }
 0x1bf   :  { %v403_v28 = vadd.f32 1.0, %v2087_v24 }
 0x1c1   :  { %2088 = vrcp.f32 %v403_v28  ;;  %v416_v62 = vand.u32 2147483648, %v403_v28  ;;  %v414_v12 = vand.u32 2147483647, %v403_v28  ;;  %vm410_vm12 = vweird.f32 %v403_v28 }
 0x1c2   :  { %2090 = vtanh.f32 %v396_v7 }
 0x1c3   :  { %v417_v8 = vor.u32 1.1754944e-38, %v416_v62  ;;  %vm415_vm14 = vcmp.eq.f32.partialorder %v414_v12, 8.507059e+37  ;;  %2092 = vpow2.f32 %v1993_v30 }
 0x1c7   :  { %v2089_v39 = vpop.eup %2088 }
 0x1c8   :  { %v406_v41 = vmul.f32 %v2089_v39, %v403_v28  ;;  %vm411_vm11 = vweird.f32 %v2089_v39  ;;  %v2091_v18 = vpop.eup %2090 }
 0x1c9   :  { %vm412_vm13 = vmor %vm410_vm12, %vm411_vm11  ;;  %v2093_v33 = vpop.eup %2092 }
 0x1ca   :  { %v407_v11 = vsub.f32 1.0, %v406_v41  ;;  %v404_v41 = vadd.f32 1.0, %v2093_v33 }
 0x1cc   :  { %v408_v2 = vmul.f32 %v2089_v39, %v407_v11  ;;  %2094 = vrcp.f32 %v404_v41  ;;  %v431_v12 = vand.u32 2147483648, %v404_v41  ;;  %vm425_vm0 = vweird.f32 %v404_v41 }
 0x1ce   :  { %v409_v14 = vadd.f32 %v2089_v39, %v408_v2 }
 0x1d0   :  { %v413_v16 = vsel %vm412_vm13, %v2089_v39, %v409_v14  ;;  %v432_v14 = vor.u32 1.1754944e-38, %v431_v12 }
 0x1d1   :  { %v418_v24 = vsel %vm415_vm14, %v417_v8, %v413_v16 }
 0x1d2   :  { %v437_v59 = vmul.f32 %v2091_v18, %v418_v24  ;;  %v2095_v11 = vpop.eup %2094  ;;  %v436_v28 = vmul.f32 0.0, %v418_v24 }
 0x1d3   :  { %v421_v22 = vmul.f32 %v2095_v11, %v404_v41  ;;  %vm426_vm15 = vweird.f32 %v2095_v11 }
 0x1d4   :  { %439 = vrot.lane.b32.xlu2 %v437_v59, %s2312_s4  ;;  %v429_v59 = vand.u32 2147483647, %v404_v41  ;;  %vm427_vm1 = vmor %vm425_vm0, %vm426_vm15 }
 0x1d5   :  { %v422_v5 = vsub.f32 1.0, %v421_v22 }
 0x1d6   :  { %vm430_vm2 = vcmp.eq.f32.partialorder %v429_v59, 8.507059e+37 }
 0x1d7   :  { %v423_v2 = vmul.f32 %v2095_v11, %v422_v5 }
 0x1d9   :  { %v424_v39 = vadd.f32 %v2095_v11, %v423_v2 }
 0x1db   :  { %v428_v7 = vsel %vm427_vm1, %v2095_v11, %v424_v39 }
 0x1dc   :  { %v433_v16 = vsel %vm430_vm2, %v432_v14, %v428_v7 }
 0x22e   :  { %v440_v9 = vpop.permute.xlu2 %439 }
 0x22f   :  { %v2768_v62 = vadd.f32 %v440_v9, %v436_v28 }
 0x231   :  { %2096 = vtanh.f32 %v2768_v62 }
 0x237   :  { %v2097_v8 = vpop.eup %2096 }
 0x238   :  { %v2771_v18 = vmul.f32 %v2097_v8, %v433_v16 }
 0x23a   :  { %446 = vrot.lane.b32.xlu0 %v2771_v18, %s2312_s4 }
 0x2ac   :  { %v2775_v9 = vpop.permute.xlu0 %446 }
 0x2ad   :  { %1994 = vmatmul.msk.f32.vlgmr.msra.gmra.mxu3 %vm351_vm3, %v2775_v9 }
 0x2ae   :  { %648 = vmatpush.msra.mxu3 %v2483_v44 }
 0x2b0   :  { %649 = vmatpush.msra.mxu3 %v2490_v45 }
 0x2b2   :  { %650 = vmatpush.msra.mxu3 %v2499_v47 }
 0x2b4   :  { %651 = vmatpush.msra.mxu3 %v2504_v48 }
 0x2b5   :  { %1995 = vmatmul.msk.f32.vlgmr.msrb.gmra.mxu3 %vm351_vm3, %v2775_v9 }
 0x2b6   :  { %652 = vmatpush.msra.mxu3 %v2511_v49 }
 0x2b8   :  { %653 = vmatpush.msra.mxu3 %v2520_v50 }
 0x2ba   :  { %654 = vmatpush.msra.mxu3 %v2529_v52 }
 0x2bc   :  { %655 = vmatpush.msra.mxu3 %v2534_v53 }
 0x2be   :  { %838 = vmatpush.msrb.mxu3 %v2483_v44 }
 0x2c0   :  { %839 = vmatpush.msrb.mxu3 %v2490_v45 }
 0x2c2   :  { %840 = vmatpush.msrb.mxu3 %v2499_v47 }
 0x2c4   :  { %841 = vmatpush.msrb.mxu3 %v2504_v48 }
 0x2c6   :  { %842 = vmatpush.msrb.mxu3 %v2511_v49 }
 0x2c8   :  { %843 = vmatpush.msrb.mxu3 %v2520_v50 }
 0x2ca   :  { %844 = vmatpush.msrb.mxu3 %v2529_v52 }
 0x2cc   :  { %845 = vmatpush.msrb.mxu3 %v2534_v53 }
 0x330   :  { %v467_v5 = vpop.f32.mrf.mxu3 }
 0x331   :  { %v490_v22 = vadd.f32 %v467_v5, %v321_v51 }
 0x333   :  { %v1996_v24 = vmul.f32 -1.442695, %v490_v22 }
 0x335   :  { %2098 = vpow2.f32 %v1996_v24 }
 0x338   :  { %v487_v41 = vpop.f32.mrf.mxu3 }
 0x339   :  { %v491_v2 = vadd.f32 %v487_v41, %v322_v6 }
 0x33b   :  { %v2099_v30 = vpop.eup %2098  ;;  %v1997_v24 = vmul.f32 -1.442695, %v491_v2 }
 0x33c   :  { %v498_v33 = vadd.f32 1.0, %v2099_v30 }
 0x33e   :  { %2100 = vrcp.f32 %v498_v33  ;;  %v511_v12 = vand.u32 2147483648, %v498_v33  ;;  %v509_v51 = vand.u32 2147483647, %v498_v33  ;;  %vm505_vm5 = vweird.f32 %v498_v33 }
 0x33f   :  { %2102 = vtanh.f32 %v491_v2 }
 0x340   :  { %v512_v14 = vor.u32 1.1754944e-38, %v511_v12  ;;  %vm510_vm7 = vcmp.eq.f32.partialorder %v509_v51, 8.507059e+37  ;;  %2104 = vpow2.f32 %v1997_v24 }
 0x344   :  { %v2101_v11 = vpop.eup %2100 }
 0x345   :  { %v501_v28 = vmul.f32 %v2101_v11, %v498_v33  ;;  %vm506_vm4 = vweird.f32 %v2101_v11  ;;  %v2103_v16 = vpop.eup %2102 }
 0x346   :  { %vm507_vm6 = vmor %vm505_vm5, %vm506_vm4  ;;  %v2105_v6 = vpop.eup %2104 }
 0x347   :  { %v502_v39 = vsub.f32 1.0, %v501_v28  ;;  %v499_v30 = vadd.f32 1.0, %v2105_v6 }
 0x349   :  { %v503_v59 = vmul.f32 %v2101_v11, %v502_v39  ;;  %2106 = vrcp.f32 %v499_v30  ;;  %v526_v51 = vand.u32 2147483648, %v499_v30  ;;  %vm520_vm12 = vweird.f32 %v499_v30 }
 0x34a   :  { %v524_v2 = vand.u32 2147483647, %v499_v30 }
 0x34b   :  { %v504_v7 = vadd.f32 %v2101_v11, %v503_v59 }
 0x34c   :  { %vm525_vm14 = vcmp.eq.f32.partialorder %v524_v2, 8.507059e+37 }
 0x34d   :  { %v508_v8 = vsel %vm507_vm6, %v2101_v11, %v504_v7 }
 0x34e   :  { %v513_v5 = vsel %vm510_vm7, %v512_v14, %v508_v8  ;;  %v527_v14 = vor.u32 1.1754944e-38, %v526_v51 }
 0x34f   :  { %v532_v22 = vmul.f32 %v2103_v16, %v513_v5  ;;  %v2107_v41 = vpop.eup %2106  ;;  %v531_v33 = vmul.f32 %v513_v5, %v2768_v62 }
 0x350   :  { %v516_v28 = vmul.f32 %v2107_v41, %v499_v30  ;;  %vm521_vm11 = vweird.f32 %v2107_v41 }
 0x351   :  { %534 = vrot.lane.b32.xlu1 %v532_v22, %s2312_s4  ;;  %vm522_vm13 = vmor %vm520_vm12, %vm521_vm11 }
 0x352   :  { %v517_v39 = vsub.f32 1.0, %v516_v28 }
 0x354   :  { %v518_v56 = vmul.f32 %v2107_v41, %v517_v39 }
 0x356   :  { %v519_v11 = vadd.f32 %v2107_v41, %v518_v56 }
 0x358   :  { %v523_v7 = vsel %vm522_vm13, %v2107_v41, %v519_v11 }
 0x359   :  { %v528_v16 = vsel %vm525_vm14, %v527_v14, %v523_v7 }
 0x3c3   :  { %v535_v59 = vpop.permute.xlu1 %534 }
 0x3c4   :  { %v2809_v12 = vadd.f32 %v535_v59, %v531_v33 }
 0x3c6   :  { %2108 = vtanh.f32 %v2809_v12 }
 0x3cc   :  { %v2109_v8 = vpop.eup %2108 }
 0x3cd   :  { %v2812_v22 = vmul.f32 %v2109_v8, %v528_v16 }
 0x3cf   :  { %541 = vrot.lane.b32.xlu2 %v2812_v22, %s2312_s4 }
 0x429   :  { %v2816_v62 = vpop.permute.xlu2 %541 }
 0x42a   :  { %1998 = vmatmul.msk.f32.vlgmr.msrb.gmra.mxu1 %vm351_vm3, %v2816_v62  ;;  %1999 = vmatmul.msk.f32.vlgmr.msrb.gmra.mxu2 %vm351_vm3, %v2816_v62 }
 0x42b   :  { %858 = vmatpush.msrb.mxu1 %v2539_v54  ;;  %933 = vmatpush.msrb.mxu2 %v2483_v44 }
 0x42d   :  { %859 = vmatpush.msrb.mxu1 %v2546_v55  ;;  %934 = vmatpush.msrb.mxu2 %v2490_v45 }
 0x42f   :  { %860 = vmatpush.msrb.mxu1 %v2560_v57  ;;  %935 = vmatpush.msrb.mxu2 %v2499_v47 }
 0x431   :  { %861 = vmatpush.msrb.mxu1 %v2568_v58  ;;  %936 = vmatpush.msrb.mxu2 %v2504_v48 }
 0x433   :  { %862 = vmatpush.msrb.mxu1 %v2576_v60  ;;  %937 = vmatpush.msrb.mxu2 %v2511_v49 }
 0x435   :  { %863 = vmatpush.msrb.mxu1 %v2584_v61  ;;  %938 = vmatpush.msrb.mxu2 %v2520_v50 }
 0x437   :  { %864 = vmatpush.msrb.mxu1 %v2596_v63  ;;  %939 = vmatpush.msrb.mxu2 %v2529_v52 }
 0x439   :  { %865 = vmatpush.msrb.mxu1 %v2604_v0  ;;  %940 = vmatpush.msrb.mxu2 %v2534_v53 }
 0x4a7   :  { %v562_v56 = vpop.f32.mrf.mxu1 }
 0x4a8   :  { %v585_v5 = vadd.f32 %v562_v56, %v323_v37 }
 0x4aa   :  { %v2000_v24 = vmul.f32 -1.442695, %v585_v5 }
 0x4ac   :  { %2110 = vpow2.f32 %v2000_v24 }
 0x4ad   :  { %v582_v41 = vpop.f32.mrf.mxu2 }
 0x4ae   :  { %v586_v39 = vadd.f32 %v582_v41, %v324_v43 }
 0x4b0   :  { %v2001_v5 = vmul.f32 -1.442695, %v586_v39 }
 0x4b2   :  { %v2111_v6 = vpop.eup %2110 }
 0x4b3   :  { %v593_v30 = vadd.f32 1.0, %v2111_v6 }
 0x4b5   :  { %2112 = vrcp.f32 %v593_v30  ;;  %v606_v11 = vand.u32 2147483648, %v593_v30  ;;  %v604_v37 = vand.u32 2147483647, %v593_v30  ;;  %vm600_vm0 = vweird.f32 %v593_v30 }
 0x4b6   :  { %2114 = vtanh.f32 %v586_v39 }
 0x4b7   :  { %v607_v7 = vor.u32 1.1754944e-38, %v606_v11  ;;  %vm605_vm2 = vcmp.eq.f32.partialorder %v604_v37, 8.507059e+37  ;;  %2116 = vpow2.f32 %v2001_v5 }
 0x4bb   :  { %v2113_v28 = vpop.eup %2112 }
 0x4bc   :  { %v596_v33 = vmul.f32 %v2113_v28, %v593_v30  ;;  %vm601_vm15 = vweird.f32 %v2113_v28  ;;  %v2115_v8 = vpop.eup %2114 }
 0x4bd   :  { %vm602_vm1 = vmor %vm600_vm0, %vm601_vm15  ;;  %v2117_v43 = vpop.eup %2116 }
 0x4be   :  { %v597_v59 = vsub.f32 1.0, %v596_v33  ;;  %v594_v24 = vadd.f32 1.0, %v2117_v43 }
 0x4c0   :  { %v598_v51 = vmul.f32 %v2113_v28, %v597_v59  ;;  %2118 = vrcp.f32 %v594_v24  ;;  %v621_v37 = vand.u32 2147483648, %v594_v24  ;;  %vm615_vm5 = vweird.f32 %v594_v24 }
 0x4c1   :  { %v619_v39 = vand.u32 2147483647, %v594_v24 }
 0x4c2   :  { %v599_v2 = vadd.f32 %v2113_v28, %v598_v51 }
 0x4c3   :  { %vm620_vm7 = vcmp.eq.f32.partialorder %v619_v39, 8.507059e+37 }
 0x4c4   :  { %v603_v14 = vsel %vm602_vm1, %v2113_v28, %v599_v2 }
 0x4c5   :  { %v608_v16 = vsel %vm605_vm2, %v607_v7, %v603_v14  ;;  %v622_v7 = vor.u32 1.1754944e-38, %v621_v37 }
 0x4c6   :  { %v627_v56 = vmul.f32 %v2115_v8, %v608_v16  ;;  %v2119_v6 = vpop.eup %2118  ;;  %v626_v30 = vmul.f32 %v608_v16, %v2809_v12 }
 0x4c7   :  { %v611_v41 = vmul.f32 %v2119_v6, %v594_v24  ;;  %vm616_vm4 = vweird.f32 %v2119_v6 }
 0x4c8   :  { %629 = vrot.lane.b32.xlu0 %v627_v56, %s2312_s4  ;;  %vm617_vm6 = vmor %vm615_vm5, %vm616_vm4 }
 0x4c9   :  { %v612_v33 = vsub.f32 1.0, %v611_v41 }
 0x4cb   :  { %v613_v59 = vmul.f32 %v2119_v6, %v612_v33 }
 0x4cd   :  { %v614_v28 = vadd.f32 %v2119_v6, %v613_v59 }
 0x4cf   :  { %v618_v2 = vsel %vm617_vm6, %v2119_v6, %v614_v28 }
 0x4d0   :  { %v623_v8 = vsel %vm620_vm7, %v622_v7, %v618_v2 }
 0x53a   :  { %v630_v51 = vpop.permute.xlu0 %629 }
 0x53b   :  { %v2850_v11 = vadd.f32 %v630_v51, %v626_v30 }
 0x53d   :  { %2120 = vtanh.f32 %v2850_v11 }
 0x543   :  { %v2121_v14 = vpop.eup %2120 }
 0x544   :  { %v2853_v56 = vmul.f32 %v2121_v14, %v623_v8 }
 0x546   :  { %636 = vrot.lane.b32.xlu1 %v2853_v56, %s2312_s4 }
 0x5b8   :  { %v2857_v12 = vpop.permute.xlu1 %636 }
 0x5b9   :  { %2002 = vmatmul.msk.f32.vlgmr.msra.gmra.mxu3 %vm351_vm3, %v2857_v12  ;;  %2003 = vmatmul.msk.f32.vlgmr.msra.gmra.mxu1 %vm351_vm3, %v2857_v12 }
 0x5ba   :  { %1028 = vmatpush.msra.mxu3 %v2483_v44  ;;  %1048 = vmatpush.msra.mxu1 %v2539_v54 }
 0x5bc   :  { %1029 = vmatpush.msra.mxu3 %v2490_v45  ;;  %1049 = vmatpush.msra.mxu1 %v2546_v55 }
 0x5be   :  { %1030 = vmatpush.msra.mxu3 %v2499_v47  ;;  %1050 = vmatpush.msra.mxu1 %v2560_v57 }
 0x5c0   :  { %1031 = vmatpush.msra.mxu3 %v2504_v48  ;;  %1051 = vmatpush.msra.mxu1 %v2568_v58 }
 0x5c2   :  { %1032 = vmatpush.msra.mxu3 %v2511_v49  ;;  %1052 = vmatpush.msra.mxu1 %v2576_v60 }
 0x5c4   :  { %1033 = vmatpush.msra.mxu3 %v2520_v50  ;;  %1053 = vmatpush.msra.mxu1 %v2584_v61 }
 0x5c6   :  { %1034 = vmatpush.msra.mxu3 %v2529_v52  ;;  %1054 = vmatpush.msra.mxu1 %v2596_v63 }
 0x5c8   :  { %1035 = vmatpush.msra.mxu3 %v2534_v53  ;;  %1055 = vmatpush.msra.mxu1 %v2604_v0 }
 0x636   :  { %v677_v50 = vpop.f32.mrf.mxu1 }
 0x637   :  { %v681_v53 = vadd.f32 %v677_v50, %v326_v35 }
 0x639   :  { %v2005_v43 = vmul.f32 -1.442695, %v681_v53 }
 0x63c   :  { %v657_v44 = vpop.f32.mrf.mxu3 }
 0x63d   :  { %v680_v45 = vadd.f32 %v657_v44, %v325_v29 }
 0x63f   :  { %v2004_v47 = vmul.f32 -1.442695, %v680_v45 }
 0x641   :  { %2122 = vpow2.f32 %v2004_v47 }
 0x647   :  { %v2123_v48 = vpop.eup %2122 }
 0x648   :  { %v688_v49 = vadd.f32 1.0, %v2123_v48 }
 0x64a   :  { %2124 = vrcp.f32 %v688_v49  ;;  %v701_v57 = vand.u32 2147483648, %v688_v49  ;;  %v699_v60 = vand.u32 2147483647, %v688_v49  ;;  %vm695_vm12 = vweird.f32 %v688_v49 }
 0x64b   :  { %2126 = vtanh.f32 %v681_v53 }
 0x64c   :  { %v702_v63 = vor.u32 1.1754944e-38, %v701_v57  ;;  %vm700_vm14 = vcmp.eq.f32.partialorder %v699_v60, 8.507059e+37  ;;  %2128 = vpow2.f32 %v2005_v43 }
 0x650   :  { %v2125_v52 = vpop.eup %2124 }
 0x651   :  { %v691_v54 = vmul.f32 %v2125_v52, %v688_v49  ;;  %vm696_vm11 = vweird.f32 %v2125_v52  ;;  %v2127_v29 = vpop.eup %2126 }
 0x652   :  { %vm697_vm13 = vmor %vm695_vm12, %vm696_vm11  ;;  %v2129_v35 = vpop.eup %2128 }
 0x653   :  { %v692_v55 = vsub.f32 1.0, %v691_v54  ;;  %v689_v24 = vadd.f32 1.0, %v2129_v35 }
 0x655   :  { %v693_v58 = vmul.f32 %v2125_v52, %v692_v55  ;;  %2130 = vrcp.f32 %v689_v24  ;;  %v716_v39 = vand.u32 2147483648, %v689_v24  ;;  %vm710_vm0 = vweird.f32 %v689_v24 }
 0x656   :  { %v714_v2 = vand.u32 2147483647, %v689_v24 }
 0x657   :  { %v694_v61 = vadd.f32 %v2125_v52, %v693_v58  ;;  %v717_v14 = vor.u32 1.1754944e-38, %v716_v39 }
 0x658   :  { %vm715_vm2 = vcmp.eq.f32.partialorder %v714_v2, 8.507059e+37 }
 0x659   :  { %v698_v0 = vsel %vm697_vm13, %v2125_v52, %v694_v61 }
 0x65a   :  { %v703_v16 = vsel %vm700_vm14, %v702_v63, %v698_v0 }
 0x65b   :  { %v722_v5 = vmul.f32 %v2127_v29, %v703_v16  ;;  %v2131_v6 = vpop.eup %2130  ;;  %v721_v30 = vmul.f32 %v703_v16, %v2850_v11 }
 0x65c   :  { %v706_v41 = vmul.f32 %v2131_v6, %v689_v24  ;;  %vm711_vm15 = vweird.f32 %v2131_v6 }
 0x65d   :  { %724 = vrot.lane.b32.xlu2 %v722_v5, %s2312_s4  ;;  %vm712_vm1 = vmor %vm710_vm0, %vm711_vm15 }
 0x65e   :  { %v707_v33 = vsub.f32 1.0, %v706_v41 }
 0x660   :  { %v708_v59 = vmul.f32 %v2131_v6, %v707_v33 }
 0x662   :  { %v709_v37 = vadd.f32 %v2131_v6, %v708_v59 }
 0x664   :  { %v713_v7 = vsel %vm712_vm1, %v2131_v6, %v709_v37 }
 0x665   :  { %v718_v44 = vsel %vm715_vm2, %v717_v14, %v713_v7 }
 0x6b7   :  { %v725_v51 = vpop.permute.xlu2 %724 }
 0x6b8   :  { %v727_v28 = vadd.f32 %v725_v51, %v721_v30 }
 0x6ba   :  { %2132 = vtanh.f32 %v727_v28 }
 0x6c0   :  { %v2133_v8 = vpop.eup %2132 }
 0x6c1   :  { %v2891_v45 = vmul.f32 %v2133_v8, %v718_v44 }
 0x6c3   :  { %731 = vrot.lane.b32.xlu0 %v2891_v45, %s2312_s4 }
 0x735   :  { %v2895_v11 = vpop.permute.xlu0 %731 }
 0x736   :  { %2006 = vmatmul.msk.f32.vlgmr.msra.gmra.mxu2 %vm351_vm3, %v2895_v11  ;;  %2007 = vmatmul.msk.f32.vlgmr.msrb.gmra.mxu0 %vm351_vm3, %v2895_v11 }
 0x7b3   :  { %v772_v53 = vpop.f32.mrf.mxu0 }
 0x7b4   :  { %v776_v55 = vadd.f32 %v772_v53, %v328_v36 }
 0x7b6   :  { %v2009_v23 = vmul.f32 -1.442695, %v776_v55 }
 0x7b9   :  { %v752_v47 = vpop.f32.mrf.mxu2 }
 0x7ba   :  { %v775_v48 = vadd.f32 %v752_v47, %v327_v26 }
 0x7bc   :  { %v2008_v49 = vmul.f32 -1.442695, %v775_v48 }
 0x7be   :  { %2134 = vpow2.f32 %v2008_v49 }
 0x7c4   :  { %v2135_v50 = vpop.eup %2134 }
 0x7c5   :  { %v783_v52 = vadd.f32 1.0, %v2135_v50 }
 0x7c7   :  { %2136 = vrcp.f32 %v783_v52  ;;  %v796_v60 = vand.u32 2147483648, %v783_v52  ;;  %v794_v19 = vand.u32 2147483647, %v783_v52  ;;  %vm790_vm5 = vweird.f32 %v783_v52 }
 0x7c8   :  { %2138 = vtanh.f32 %v776_v55 }
 0x7c9   :  { %v797_v26 = vor.u32 1.1754944e-38, %v796_v60  ;;  %vm795_vm7 = vcmp.eq.f32.partialorder %v794_v19, 8.507059e+37  ;;  %2140 = vpow2.f32 %v2009_v23 }
 0x7cd   :  { %v2137_v54 = vpop.eup %2136 }
 0x7ce   :  { %v786_v57 = vmul.f32 %v2137_v54, %v783_v52  ;;  %vm791_vm4 = vweird.f32 %v2137_v54  ;;  %v2139_v0 = vpop.eup %2138 }
 0x7cf   :  { %vm792_vm6 = vmor %vm790_vm5, %vm791_vm4  ;;  %v2141_v32 = vpop.eup %2140 }
 0x7d0   :  { %v787_v58 = vsub.f32 1.0, %v786_v57  ;;  %v784_v36 = vadd.f32 1.0, %v2141_v32 }
 0x7d2   :  { %v788_v61 = vmul.f32 %v2137_v54, %v787_v58  ;;  %2142 = vrcp.f32 %v784_v36  ;;  %v811_v30 = vand.u32 2147483648, %v784_v36  ;;  %vm805_vm12 = vweird.f32 %v784_v36 }
 0x7d3   :  { %v809_v51 = vand.u32 2147483647, %v784_v36 }
 0x7d4   :  { %v789_v27 = vadd.f32 %v2137_v54, %v788_v61  ;;  %v812_v39 = vor.u32 1.1754944e-38, %v811_v30 }
 0x7d5   :  { %vm810_vm14 = vcmp.eq.f32.partialorder %v809_v51, 8.507059e+37  ;;  %v3191_v51 = vsel %vm2675_vm9, %v2715_v42, %v2661_v10 }
 0x7d6   :  { %v793_v63 = vsel %vm792_vm6, %v2137_v54, %v789_v27 }
 0x7d7   :  { %v798_v29 = vsel %vm795_vm7, %v797_v26, %v793_v63 }
 0x7d8   :  { %v817_v16 = vmul.f32 %v2139_v0, %v798_v29  ;;  %v2143_v5 = vpop.eup %2142  ;;  %v816_v6 = vmul.f32 %v798_v29, %v727_v28 }
 0x7d9   :  { %v801_v43 = vmul.f32 %v2143_v5, %v784_v36  ;;  %vm806_vm11 = vweird.f32 %v2143_v5 }
 0x7da   :  { %819 = vrot.lane.b32.xlu1 %v817_v16, %s2312_s4  ;;  %vm807_vm13 = vmor %vm805_vm12, %vm806_vm11 }
 0x7db   :  { %v802_v35 = vsub.f32 1.0, %v801_v43 }
 0x7dd   :  { %v803_v24 = vmul.f32 %v2143_v5, %v802_v35 }
 0x7df   :  { %v804_v59 = vadd.f32 %v2143_v5, %v803_v24 }
 0x7e1   :  { %v808_v37 = vsel %vm807_vm13, %v2143_v5, %v804_v59 }
 0x7e2   :  { %v813_v7 = vsel %vm810_vm14, %v812_v39, %v808_v37 }
 0x84c   :  { %v820_v41 = vpop.permute.xlu1 %819 }
 0x84d   :  { %v822_v33 = vadd.f32 %v820_v41, %v816_v6 }
 0x84f   :  { %2144 = vtanh.f32 %v822_v33 }
 0x855   :  { %v2145_v2 = vpop.eup %2144 }
 0x856   :  { %v2912_v14 = vmul.f32 %v2145_v2, %v813_v7 }
 0x858   :  { %826 = vrot.lane.b32.xlu2 %v2912_v14, %s2312_s4 }
 0x8b2   :  { %v2916_v28 = vpop.permute.xlu2 %826 }
 0x8b3   :  { %2010 = vmatmul.msk.f32.vlgmr.msrb.gmra.mxu3 %vm351_vm3, %v2916_v28  ;;  %2011 = vmatmul.msk.f32.vlgmr.msrb.gmra.mxu1 %vm351_vm3, %v2916_v28 }
 0x930   :  { %v867_v50 = vpop.f32.mrf.mxu1 }
 0x931   :  { %v871_v53 = vadd.f32 %v867_v50, %v330_v46 }
 0x933   :  { %v2013_v17 = vmul.f32 -1.442695, %v871_v53 }
 0x936   :  { %v847_v8 = vpop.f32.mrf.mxu3 }
 0x937   :  { %v870_v44 = vadd.f32 %v847_v8, %v329_v38 }
 0x939   :  { %v2012_v47 = vmul.f32 -1.442695, %v870_v44 }
 0x93b   :  { %2146 = vpow2.f32 %v2012_v47  ;;  %v3192_v47 = vsel %vm2689_vm10, %v2733_v1, %v2663_v13 }
 0x941   :  { %v2147_v48 = vpop.eup %2146 }
 0x942   :  { %v878_v49 = vadd.f32 1.0, %v2147_v48 }
 0x944   :  { %2148 = vrcp.f32 %v878_v49  ;;  %v891_v57 = vand.u32 2147483648, %v878_v49  ;;  %v889_v15 = vand.u32 2147483647, %v878_v49  ;;  %vm885_vm0 = vweird.f32 %v878_v49 }
 0x945   :  { %2150 = vtanh.f32 %v871_v53 }
 0x946   :  { %v892_v38 = vor.u32 1.1754944e-38, %v891_v57  ;;  %vm890_vm2 = vcmp.eq.f32.partialorder %v889_v15, 8.507059e+37  ;;  %2152 = vpow2.f32 %v2013_v17 }
 0x94a   :  { %v2149_v52 = vpop.eup %2148 }
 0x94b   :  { %v881_v54 = vmul.f32 %v2149_v52, %v878_v49  ;;  %vm886_vm15 = vweird.f32 %v2149_v52  ;;  %v2151_v61 = vpop.eup %2150 }
 0x94c   :  { %vm887_vm1 = vmor %vm885_vm0, %vm886_vm15  ;;  %v2153_v40 = vpop.eup %2152 }
 0x94d   :  { %v882_v55 = vsub.f32 1.0, %v881_v54  ;;  %v879_v46 = vadd.f32 1.0, %v2153_v40 }
 0x94f   :  { %v883_v58 = vmul.f32 %v2149_v52, %v882_v55  ;;  %2154 = vrcp.f32 %v879_v46  ;;  %v906_v5 = vand.u32 2147483648, %v879_v46  ;;  %vm900_vm5 = vweird.f32 %v879_v46 }
 0x950   :  { %v904_v43 = vand.u32 2147483647, %v879_v46 }
 0x951   :  { %v884_v34 = vadd.f32 %v2149_v52, %v883_v58  ;;  %v907_v24 = vor.u32 1.1754944e-38, %v906_v5  ;;  %v1117_v5 = vld [vmem:[#allocation2 + $0x38] sm:$0xff] }
 0x952   :  { %vm905_vm7 = vcmp.eq.f32.partialorder %v904_v43, 8.507059e+37  ;;  %v1114_v43 = vld [vmem:[#allocation2 + $0x20] sm:$0xff]  ;;  %1305 = vmatpush.msrb.mxu1 %v1117_v5  ;;  %v1345_v5 = vld [vmem:[%s3181_s6 + $0x18] sm:$0xff] }
 0x953   :  { %v888_v60 = vsel %vm887_vm1, %v2149_v52, %v884_v34 }
 0x954   :  { %v893_v19 = vsel %vm890_vm2, %v892_v38, %v888_v60 }
 0x955   :  { %v912_v27 = vmul.f32 %v2151_v61, %v893_v19  ;;  %v2155_v26 = vpop.eup %2154  ;;  %v911_v16 = vmul.f32 %v893_v19, %v822_v33 }
 0x956   :  { %v896_v63 = vmul.f32 %v2155_v26, %v879_v46  ;;  %vm901_vm4 = vweird.f32 %v2155_v26 }
 0x957   :  { %914 = vrot.lane.b32.xlu0 %v912_v27, %s2312_s4  ;;  %vm902_vm6 = vmor %vm900_vm5, %vm901_vm4 }
 0x958   :  { %v897_v0 = vsub.f32 1.0, %v896_v63 }
 0x95a   :  { %v898_v29 = vmul.f32 %v2155_v26, %v897_v0 }
 0x95c   :  { %v899_v36 = vadd.f32 %v2155_v26, %v898_v29 }
 0x95e   :  { %v903_v35 = vsel %vm902_vm6, %v2155_v26, %v899_v36 }
 0x95f   :  { %v908_v41 = vsel %vm905_vm7, %v907_v24, %v903_v35  ;;  %v1115_v35 = vld [vmem:[#allocation2 + $0x28] sm:$0xff]  ;;  %v1112_v24 = vld [vmem:[#allocation2 + $0x10] sm:$0xff] }
 0x960   :  { %1306 = vmatpush.msrb.mxu1 %v1115_v35 }
 0x9c9   :  { %v915_v23 = vpop.permute.xlu0 %914 }
 0x9ca   :  { %v917_v32 = vadd.f32 %v915_v23, %v911_v16 }
 0x9cc   :  { %2156 = vtanh.f32 %v917_v32 }
 0x9d2   :  { %v2157_v6 = vpop.eup %2156 }
 0x9d3   :  { %v2933_v59 = vmul.f32 %v2157_v6, %v908_v41  ;;  %v1113_v6 = vld [vmem:[#allocation2 + $0x18] sm:$0xff]  ;;  %v1110_v41 = vld [vmem:[#allocation2] sm:$0xff] }
 0x9d4   :  { %1307 = vmatpush.msrb.mxu1 %v1113_v6  ;;  %v1342_v6 = vld [vmem:[%s3181_s6] sm:$0xff] }
 0x9d5   :  { %921 = vrot.lane.b32.xlu1 %v2933_v59, %s2312_s4 }
 0xa47   :  { %v2937_v33 = vpop.permute.xlu1 %921 }
 0xa48   :  { %2014 = vmatmul.msk.f32.vlgmr.msrb.gmra.mxu2 %vm351_vm3, %v2937_v33  ;;  %2015 = vmatmul.msk.f32.vlgmr.msra.gmra.mxu0 %vm351_vm3, %v2937_v33 }
 0xac5   :  { %v962_v8 = vpop.f32.mrf.mxu0 }
 0xac6   :  { %v966_v48 = vadd.f32 %v962_v8, %v3192_v47 }
 0xac8   :  { %v2017_v13 = vmul.f32 -1.442695, %v966_v48 }
 0xacb   :  { %v942_v30 = vpop.f32.mrf.mxu2 }
 0xacc   :  { %v965_v37 = vadd.f32 %v942_v30, %v3191_v51  ;;  %v1111_v30 = vld [vmem:[#allocation2 + $0x8] sm:$0xff] }
 0xacd   :  { %1308 = vmatpush.msrb.mxu1 %v1111_v30 }
 0xace   :  { %v2016_v39 = vmul.f32 -1.442695, %v965_v37 }
 0xad0   :  { %2158 = vpow2.f32 %v2016_v39 }
 0xad6   :  { %v2159_v2 = vpop.eup %2158 }
 0xad7   :  { %v973_v7 = vadd.f32 1.0, %v2159_v2 }
 0xad9   :  { %2160 = vrcp.f32 %v973_v7  ;;  %v986_v52 = vand.u32 2147483648, %v973_v7  ;;  %v984_v10 = vand.u32 2147483647, %v973_v7  ;;  %vm980_vm12 = vweird.f32 %v973_v7 }
 0xada   :  { %2162 = vtanh.f32 %v966_v48 }
 0xadb   :  { %v987_v54 = vor.u32 1.1754944e-38, %v986_v52  ;;  %vm985_vm14 = vcmp.eq.f32.partialorder %v984_v10, 8.507059e+37  ;;  %2164 = vpow2.f32 %v2017_v13 }
 0xadf   :  { %v2161_v44 = vpop.eup %2160 }
 0xae0   :  { %v976_v49 = vmul.f32 %v2161_v44, %v973_v7  ;;  %vm981_vm11 = vweird.f32 %v2161_v44  ;;  %v2163_v57 = vpop.eup %2162  ;;  %v3194_v7 = vsel %vm2689_vm10, %v2757_v21, %v2755_v20 }
 0xae1   :  { %vm982_vm13 = vmor %vm980_vm12, %vm981_vm11  ;;  %v2165_v1 = vpop.eup %2164 }
 0xae2   :  { %v977_v50 = vsub.f32 1.0, %v976_v49  ;;  %v974_v34 = vadd.f32 1.0, %v2165_v1  ;;  %v1124_v1 = vld [vmem:[#allocation2 + $0x70] sm:$0xff] }
 0xae3   :  { %1171 = vmatpush.msra.mxu2 %v1124_v1 }
 0xae4   :  { %v978_v53 = vmul.f32 %v2161_v44, %v977_v50  ;;  %2166 = vrcp.f32 %v974_v34  ;;  %v1001_v26 = vand.u32 2147483648, %v974_v34  ;;  %vm995_vm0 = vweird.f32 %v974_v34 }
 0xae5   :  { %v999_v63 = vand.u32 2147483647, %v974_v34 }
 0xae6   :  { %v979_v42 = vadd.f32 %v2161_v44, %v978_v53  ;;  %v1002_v29 = vor.u32 1.1754944e-38, %v1001_v26 }
 0xae7   :  { %vm1000_vm2 = vcmp.eq.f32.partialorder %v999_v63, 8.507059e+37 }
 0xae8   :  { %v983_v55 = vsel %vm982_vm13, %v2161_v44, %v979_v42 }
 0xae9   :  { %v988_v58 = vsel %vm985_vm14, %v987_v54, %v983_v55 }
 0xaea   :  { %v1007_v15 = vmul.f32 %v2163_v57, %v988_v58  ;;  %v2167_v38 = vpop.eup %2166  ;;  %v1006_v27 = vmul.f32 %v988_v58, %v917_v32  ;;  %v1116_v32 = vld [vmem:[#allocation2 + $0x30] sm:$0xff] }
 0xaeb   :  { %v991_v60 = vmul.f32 %v2167_v38, %v974_v34  ;;  %vm996_vm15 = vweird.f32 %v2167_v38  ;;  %1264 = vmatpush.msrb.mxu3 %v1116_v32  ;;  %v1125_v34 = vld [vmem:[#allocation2 + $0x78] sm:$0xff] }
 0xaec   :  { %1009 = vrot.lane.b32.xlu2 %v1007_v15, %s2312_s4  ;;  %vm997_vm1 = vmor %vm995_vm0, %vm996_vm15  ;;  %1212 = vmatpush.msrb.mxu0 %v1125_v34 }
 0xaed   :  { %v992_v61 = vsub.f32 1.0, %v991_v60  ;;  %1265 = vmatpush.msrb.mxu3 %v1114_v43  ;;  %v1123_v60 = vld [vmem:[#allocation2 + $0x68] sm:$0xff]  ;;  %v1344_v43 = vld [vmem:[%s3181_s6 + $0x10] sm:$0xff] }
 0xaee   :  { %1213 = vmatpush.msrb.mxu0 %v1123_v60 }
 0xaef   :  { %v993_v19 = vmul.f32 %v2167_v38, %v992_v61  ;;  %1266 = vmatpush.msrb.mxu3 %v1112_v24  ;;  %v1120_v61 = vld [vmem:[#allocation2 + $0x50] sm:$0xff] }
 0xaf1   :  { %v994_v46 = vadd.f32 %v2167_v38, %v993_v19  ;;  %1267 = vmatpush.msrb.mxu3 %v1110_v41  ;;  %v1121_v19 = vld [vmem:[#allocation2 + $0x58] sm:$0xff] }
 0xaf2   :  { %1214 = vmatpush.msrb.mxu0 %v1121_v19 }
 0xaf3   :  { %v998_v0 = vsel %vm997_vm1, %v2167_v38, %v994_v46  ;;  %v1122_v38 = vld [vmem:[#allocation2 + $0x60] sm:$0xff]  ;;  %v1119_v46 = vld [vmem:[#allocation2 + $0x48] sm:$0xff] }
 0xaf4   :  { %v1003_v23 = vsel %vm1000_vm2, %v1002_v29, %v998_v0  ;;  %1172 = vmatpush.msra.mxu2 %v1122_v38  ;;  %1215 = vmatpush.msrb.mxu0 %v1119_v46 }
 0xaf6   :  { %1173 = vmatpush.msra.mxu2 %v1120_v61  ;;  %1423 = vmatpush.msra.mxu0 %v1345_v5 }
 0xaf8   :  { %1424 = vmatpush.msra.mxu0 %v1344_v43 }
 0xb46   :  { %v1010_v17 = vpop.permute.xlu2 %1009 }
 0xb47   :  { %v2954_v40 = vadd.f32 %v1010_v17, %v1006_v27  ;;  %v1118_v17 = vld [vmem:[#allocation2 + $0x40] sm:$0xff] }
 0xb48   :  { %1174 = vmatpush.msra.mxu2 %v1118_v17 }
 0xb49   :  { %2168 = vtanh.f32 %v2954_v40 }
 0xb4a   :  { %1360 = vmatpush.msrb.mxu2 %v1345_v5 }
 0xb4c   :  { %1361 = vmatpush.msrb.mxu2 %v1344_v43 }
 0xb4f   :  { %v2169_v16 = vpop.eup %2168 }
 0xb50   :  { %v1014_v36 = vmul.f32 %v2169_v16, %v1003_v23 }
 0xb52   :  { %1016 = vrot.lane.b32.xlu0 %v1014_v36, %s2312_s4 }
 0xb5a   :  { %1129 = vrot.lane.b32.xlu0 %v1014_v36, %s2313_s24 }
 0xb62   :  { %1135 = vrot.lane.b32.xlu0 %v2891_v45, %s2313_s24 }
 0xb6a   :  { %1141 = vrot.lane.b32.xlu0 %v2771_v18, %s2313_s24 }
 0xbc4   :  { %v1017_v45 = vpop.permute.xlu0 %1016 }
 0xbc5   :  { %2018 = vmatmul.msk.f32.vlgmr.msra.gmra.mxu3 %vm351_vm3, %v1017_v45  ;;  %2019 = vmatmul.msk.f32.vlgmr.msra.gmra.mxu1 %vm351_vm3, %v1017_v45 }
 0xbc6   :  { %1549 = vmatpush.msra.mxu3 %v1345_v5  ;;  %1675 = vmatpush.msra.mxu1 %v1345_v5 }
 0xbc8   :  { %1550 = vmatpush.msra.mxu3 %v1344_v43  ;;  %1676 = vmatpush.msra.mxu1 %v1344_v43 }
 0xbcc   :  { %v1130_v35 = vpop.permute.xlu0 %1129 }
 0xbcd   :  { %2038 = vmatmul.msk.f32.vlgmr.msrb.gmra.mxu3 %vm181_vm8, %v2775_v9  ;;  %2046 = vmatmul.msk.f32.vlgmr.msrb.gmra.mxu1 %vm181_vm8, %v2775_v9 }
 0xbd4   :  { %v1136_v30 = vpop.permute.xlu0 %1135 }
 0xbd5   :  { %2039 = vmatmul.msk.f32.gmra.mxu3 %vm181_vm8, %v2816_v62  ;;  %2047 = vmatmul.msk.f32.gmra.mxu1 %vm181_vm8, %v2816_v62  ;;  %v3193_v62 = vsel %vm2675_vm9, %v2737_v4, %v2735_v3 }
 0xbdd   :  { %2040 = vmatmul.msk.f32.gmra.mxu3 %vm181_vm8, %v2857_v12  ;;  %2048 = vmatmul.msk.f32.gmra.mxu1 %vm181_vm8, %v2857_v12 }
 0xbe5   :  { %2041 = vmatmul.msk.f32.gmra.mxu3 %vm181_vm8, %v2895_v11  ;;  %2049 = vmatmul.msk.f32.gmra.mxu1 %vm181_vm8, %v2895_v11 }
 0xbed   :  { %2042 = vmatmul.msk.f32.gmra.mxu3 %vm181_vm8, %v2916_v28  ;;  %2050 = vmatmul.msk.f32.gmra.mxu1 %vm181_vm8, %v2916_v28 }
 0xbf5   :  { %2043 = vmatmul.msk.f32.gmra.mxu3 %vm181_vm8, %v2937_v33  ;;  %2051 = vmatmul.msk.f32.gmra.mxu1 %vm181_vm8, %v2937_v33 }
 0xbfd   :  { %2044 = vmatmul.msk.f32.gmra.mxu3 %vm181_vm8, %v1017_v45  ;;  %2052 = vmatmul.msk.f32.gmra.mxu1 %vm181_vm8, %v1017_v45 }
 0xc42   :  { %v1057_v18 = vpop.f32.mrf.mxu1 }
 0xc43   :  { %v1061_v8 = vadd.f32 %v1057_v18, %v3194_v7 }
 0xc45   :  { %v2021_v54 = vmul.f32 -1.442695, %v1061_v8 }
 0xc48   :  { %v1037_v9 = vpop.f32.mrf.mxu3 }
 0xc49   :  { %v1060_v12 = vadd.f32 %v1037_v9, %v3193_v62  ;;  %v1142_v9 = vpop.permute.xlu0 %1141  ;;  %v3195_v62 = vmov 0.0  }
 0xc4a   :  { %v1310_v11 = vpop.f32.mrf.mxu1 }
 0xc4b   :  { %v2020_v28 = vmul.f32 -1.442695, %v1060_v12 }
 0xc4d   :  { %2170 = vpow2.f32 %v2020_v28 }
 0xc52   :  { %v1312_v51 = vpop.f32.mrf.mxu1 }
 0xc53   :  { %v2171_v37 = vpop.eup %2170 }
 0xc54   :  { %v1068_v39 = vadd.f32 1.0, %v2171_v37 }
 0xc56   :  { %2172 = vrcp.f32 %v1068_v39  ;;  %v1081_v3 = vand.u32 2147483648, %v1068_v39  ;;  %v1079_v47 = vand.u32 2147483647, %v1068_v39  ;;  %vm1075_vm3 = vweird.f32 %v1068_v39 }
 0xc57   :  { %2174 = vtanh.f32 %v1061_v8 }
 0xc58   :  { %v1082_v50 = vor.u32 1.1754944e-38, %v1081_v3  ;;  %vm1080_vm5 = vcmp.eq.f32.partialorder %v1079_v47, 8.507059e+37  ;;  %2176 = vpow2.f32 %v2021_v54 }
 0xc5a   :  { %v1314_v33 = vpop.f32.mrf.mxu1 }
 0xc5c   :  { %v2173_v2 = vpop.eup %2172 }
 0xc5d   :  { %v1071_v25 = vmul.f32 %v2173_v2, %v1068_v39  ;;  %vm1076_vm9 = vweird.f32 %v2173_v2  ;;  %v2175_v53 = vpop.eup %2174 }
 0xc5e   :  { %vm1077_vm4 = vmor %vm1075_vm3, %vm1076_vm9  ;;  %v2177_v55 = vpop.eup %2176 }
 0xc5f   :  { %v1072_v44 = vsub.f32 1.0, %v1071_v25  ;;  %v1069_v57 = vadd.f32 1.0, %v2177_v55 }
 0xc61   :  { %v1073_v4 = vmul.f32 %v2173_v2, %v1072_v44  ;;  %2178 = vrcp.f32 %v1069_v57  ;;  %v1096_v0 = vand.u32 2147483648, %v1069_v57  ;;  %vm1090_vm6 = vweird.f32 %v1069_v57 }
 0xc62   :  { %v1316_v48 = vpop.f32.mrf.mxu1  ;;  %v1094_v29 = vand.u32 2147483647, %v1069_v57 }
 0xc63   :  { %v1074_v49 = vadd.f32 %v2173_v2, %v1073_v4  ;;  %v1097_v23 = vor.u32 1.1754944e-38, %v1096_v0  ;;  %v3059_v48 = vld [vmem:[%s3182_s7] sm:$0x3]  ;;  %s2314_s7 = smov 96  }
 0xc64   :  { %vm1095_vm11 = vcmp.eq.f32.partialorder %v1094_v29, 8.507059e+37 }
 0xc65   :  { %v1078_v52 = vsel %vm1077_vm4, %v2173_v2, %v1074_v49  ;;  %v1269_v49 = vpop.f32.mrf.mxu3 }
 0xc66   :  { %v1083_v31 = vsel %vm1080_vm5, %v1082_v50, %v1078_v52  ;;  %v3062_v52 = vperm.slane %v3059_v48, 0 }
 0xc67   :  { %v1102_v10 = vmul.f32 %v2175_v53, %v1083_v31  ;;  %v2179_v58 = vpop.eup %2178 }
 0xc68   :  { %v1086_v15 = vmul.f32 %v2179_v58, %v1069_v57  ;;  %vm1091_vm10 = vweird.f32 %v2179_v58 }
 0xc69   :  { %1104 = vrot.lane.b32.xlu1 %v1102_v10, %s2312_s4  ;;  %vm1092_vm7 = vmor %vm1090_vm6, %vm1091_vm10 }
 0xc6a   :  { %v1318_v20 = vpop.f32.mrf.mxu1  ;;  %v1087_v13 = vsub.f32 1.0, %v1086_v15 }
 0xc71   :  { %1131 = vrot.lane.b32.xlu1 %v2933_v59, %s2313_s24  ;;  %v1088_v59 = vmul.f32 %v2179_v58, %v1087_v13 }
 0xc72   :  { %v1320_v21 = vpop.f32.mrf.mxu1 }
 0xc73   :  { %v1089_v63 = vadd.f32 %v2179_v58, %v1088_v59 }
 0xc75   :  { %v1093_v16 = vsel %vm1092_vm7, %v2179_v58, %v1089_v63 }
 0xc76   :  { %v1098_v36 = vsel %vm1095_vm11, %v1097_v23, %v1093_v16  ;;  %v1272_v16 = vpop.f32.mrf.mxu3 }
 0xc79   :  { %1137 = vrot.lane.b32.xlu1 %v2853_v56, %s2313_s24  ;;  %v1101_v56 = vmul.f32 %v1083_v31, %v2954_v40 }
 0xc7a   :  { %v1322_v42 = vpop.f32.mrf.mxu1 }
 0xcdb   :  { %v1105_v27 = vpop.permute.xlu1 %1104 }
 0xcdc   :  { %v1107_v26 = vadd.f32 %v1105_v27, %v1101_v56 }
 0xcde   :  { %2180 = vtanh.f32 %v1107_v26 }
 0xce3   :  { %v1132_v24 = vpop.permute.xlu1 %1131 }
 0xce4   :  { %v2181_v40 = vpop.eup %2180 }
 0xce5   :  { %v3007_v32 = vmul.f32 %v2181_v40, %v1098_v36 }
 0xce7   :  { %1127 = vrot.lane.b32.xlu2 %v3007_v32, %s2313_s24 }
 0xceb   :  { %v1138_v45 = vpop.permute.xlu1 %1137 }
 0xcef   :  { %1133 = vrot.lane.b32.xlu2 %v2912_v14, %s2313_s24 }
 0xcf7   :  { %1139 = vrot.lane.b32.xlu2 %v2812_v22, %s2313_s24  ;;  %v1343_v22 = vld [vmem:[%s3181_s6 + $0x8] sm:$0xff] }
 0xcf8   :  { %1362 = vmatpush.msrb.mxu2 %v1343_v22  ;;  %1425 = vmatpush.msra.mxu0 %v1343_v22 }
 0xcf9   :  { %1551 = vmatpush.msra.mxu3 %v1343_v22  ;;  %1677 = vmatpush.msra.mxu1 %v1343_v22 }
 0xcfa   :  { %1363 = vmatpush.msrb.mxu2 %v1342_v6  ;;  %1426 = vmatpush.msra.mxu0 %v1342_v6 }
 0xcfb   :  { %1552 = vmatpush.msra.mxu3 %v1342_v6  ;;  %1678 = vmatpush.msra.mxu1 %v1342_v6 }
 0xcfd   :  { %1801 = vmatpush.msrb.mxu3 %v1345_v5 }
 0xcff   :  { %1802 = vmatpush.msrb.mxu3 %v1344_v43 }
 0xd01   :  { %1803 = vmatpush.msrb.mxu3 %v1343_v22 }
 0xd03   :  { %1804 = vmatpush.msrb.mxu3 %v1342_v6 }
 0xd41   :  { %v1128_v14 = vpop.permute.xlu2 %1127 }
 0xd42   :  { %2022 = vmatmul.msk.f32.vlgmr.msra.gmra.mxu2 %vm181_vm8, %v1128_v14  ;;  %2030 = vmatmul.msk.f32.vlgmr.msrb.gmra.mxu0 %vm181_vm8, %v1128_v14 }
 0xd43   :  { %1486 = vmatpush.msra.mxu2 %v1345_v5  ;;  %1612 = vmatpush.msrb.mxu0 %v1345_v5 }
 0xd45   :  { %1487 = vmatpush.msra.mxu2 %v1344_v43  ;;  %1613 = vmatpush.msrb.mxu0 %v1344_v43 }
 0xd47   :  { %1488 = vmatpush.msra.mxu2 %v1343_v22  ;;  %1614 = vmatpush.msrb.mxu0 %v1343_v22 }
 0xd49   :  { %v1134_v41 = vpop.permute.xlu2 %1133  ;;  %1489 = vmatpush.msra.mxu2 %v1342_v6  ;;  %1615 = vmatpush.msrb.mxu0 %v1342_v6 }
 0xd4a   :  { %2023 = vmatmul.msk.f32.gmra.mxu2 %vm181_vm8, %v1130_v35  ;;  %2031 = vmatmul.msk.f32.gmra.mxu0 %vm181_vm8, %v1130_v35 }
 0xd51   :  { %v1140_v18 = vpop.permute.xlu2 %1139 }
 0xd52   :  { %2024 = vmatmul.msk.f32.gmra.mxu2 %vm181_vm8, %v1132_v24  ;;  %2032 = vmatmul.msk.f32.gmra.mxu0 %vm181_vm8, %v1132_v24 }
 0xd5a   :  { %2025 = vmatmul.msk.f32.gmra.mxu2 %vm181_vm8, %v1134_v41  ;;  %2033 = vmatmul.msk.f32.gmra.mxu0 %vm181_vm8, %v1134_v41 }
 0xd62   :  { %2026 = vmatmul.msk.f32.gmra.mxu2 %vm181_vm8, %v1136_v30  ;;  %2034 = vmatmul.msk.f32.gmra.mxu0 %vm181_vm8, %v1136_v30 }
 0xd6a   :  { %2027 = vmatmul.msk.f32.gmra.mxu2 %vm181_vm8, %v1138_v45  ;;  %2035 = vmatmul.msk.f32.gmra.mxu0 %vm181_vm8, %v1138_v45 }
 0xd72   :  { %2028 = vmatmul.msk.f32.gmra.mxu2 %vm181_vm8, %v1140_v18  ;;  %2036 = vmatmul.msk.f32.gmra.mxu0 %vm181_vm8, %v1140_v18 }
 0xd7a   :  { %2029 = vmatmul.msk.f32.gmra.mxu2 %vm181_vm8, %v1142_v9  ;;  %2037 = vmatmul.msk.f32.gmra.mxu0 %vm181_vm8, %v1142_v9 }
 0xd82   :  { %1364 = vmatmul.f32.vlgmr.msrb.gmra.mxu2 %v3195_v62 }
 0xd83   :  { %1738 = vmatpush.msrb.mxu2 %v1345_v5 }
 0xd85   :  { %1739 = vmatpush.msrb.mxu2 %v1344_v43 }
 0xd87   :  { %1740 = vmatpush.msrb.mxu2 %v1343_v22 }
 0xd89   :  { %1741 = vmatpush.msrb.mxu2 %v1342_v6 }
 0xdbf   :  { %v1217_v12 = vpop.f32.mrf.mxu0 }
 0xdc5   :  { %v1176_v11 = vpop.f32.mrf.mxu2 }
 0xdc6   :  { %v1270_v50 = vadd.f32 %v1269_v49, %v1176_v11 }
 0xdc7   :  { %v1219_v28 = vpop.f32.mrf.mxu0 }
 0xdc8   :  { %v1333_v53 = vadd.f32 %v3062_v52, %v1270_v50 }
 0xdcd   :  { %v1179_v51 = vpop.f32.mrf.mxu2 }
 0xdce   :  { %v1273_v23 = vadd.f32 %v1272_v16, %v1179_v51 }
 0xdcf   :  { %v1221_v37 = vpop.f32.mrf.mxu0 }
 0xdd0   :  { %v1334_v40 = vadd.f32 %v3062_v52, %v1273_v23 }
 0xdd5   :  { %v3044_v39 = vpop.f32.mrf.mxu2 }
 0xdd7   :  { %v1223_v33 = vpop.f32.mrf.mxu0 }
 0xddd   :  { %v3046_v2 = vpop.f32.mrf.mxu2 }
 0xddf   :  { %v1225_v7 = vpop.f32.mrf.mxu0 }
 0xde5   :  { %v3048_v8 = vpop.f32.mrf.mxu2 }
 0xde7   :  { %v1227_v25 = vpop.f32.mrf.mxu0 }
 0xded   :  { %v3050_v44 = vpop.f32.mrf.mxu2 }
 0xdef   :  { %v1229_v3 = vpop.f32.mrf.mxu0 }
 0xdf5   :  { %v3052_v4 = vpop.f32.mrf.mxu2 }
 0xdf7   :  { %v3070_v29 = vpop.f32.mrf.mxu0 }
 0xdfd   :  { %v3054_v47 = vpop.f32.mrf.mxu2 }
 0xe05   :  { %v1365_v31 = vpop.f32.mrf.mxu2 }
 0xe06   :  { %v1368_v10 = vadd.f32 %v1365_v31, %v1333_v53  ;;  %v1275_v53 = vpop.f32.mrf.mxu3 }
 0xe07   :  { %v1276_v31 = vadd.f32 %v1275_v53, %v3044_v39 }
 0xe08   :  { %2182 = vtanh.f32 %v1368_v10  ;;  %v2054_v21 = vmul.f32 -1.442695, %v1368_v10 }
 0xe09   :  { %v1335_v10 = vadd.f32 %v3062_v52, %v1276_v31 }
 0xe0a   :  { %2184 = vpow2.f32 %v2054_v21 }
 0xe0e   :  { %v2183_v20 = vpop.eup %2182  ;;  %v1278_v23 = vpop.f32.mrf.mxu3 }
 0xe0f   :  { %1391 = vrot.lane.b32.xlu1 %v2183_v20, %s2312_s4 }
 0xe10   :  { %v2185_v42 = vpop.eup %2184 }
 0xe11   :  { %v1372_v54 = vadd.f32 1.0, %v2185_v42 }
 0xe13   :  { %2186 = vrcp.f32 %v1372_v54  ;;  %v1384_v1 = vand.u32 2147483648, %v1372_v54  ;;  %vm1378_vm13 = vweird.f32 %v1372_v54  ;;  %v1382_v34 = vand.u32 2147483647, %v1372_v54 }
 0xe15   :  { %v1385_v60 = vor.u32 1.1754944e-38, %v1384_v1  ;;  %vm1383_vm15 = vcmp.eq.f32.partialorder %v1382_v34, 8.507059e+37 }
 0xe19   :  { %v2187_v55 = vpop.eup %2186 }
 0xe1a   :  { %v1374_v57 = vmul.f32 %v2187_v55, %v1372_v54  ;;  %vm1379_vm12 = vweird.f32 %v2187_v55 }
 0xe1b   :  { %vm1380_vm14 = vmor %vm1378_vm13, %vm1379_vm12 }
 0xe1c   :  { %v1375_v58 = vsub.f32 1.0, %v1374_v57 }
 0xe1e   :  { %v1376_v15 = vmul.f32 %v2187_v55, %v1375_v58 }
 0xe20   :  { %v1377_v13 = vadd.f32 %v2187_v55, %v1376_v15 }
 0xe22   :  { %v1381_v38 = vsel %vm1380_vm14, %v2187_v55, %v1377_v13 }
 0xe23   :  { %v1386_v61 = vsel %vm1383_vm15, %v1385_v60, %v1381_v38 }
 0xe24   :  { %v1389_v56 = vmul.f32 0.0, %v1386_v61 }
 0xe81   :  { %v1392_v59 = vpop.permute.xlu1 %1391 }
 0xe82   :  { %v1394_v19 = vmul.f32 %v1392_v59, %v1386_v61 }
 0xe84   :  { %1396 = vrot.lane.b32.xlu2 %v1394_v19, %s2313_s24 }
 0xede   :  { %v1397_v27 = vpop.permute.xlu2 %1396 }
 0xedf   :  { %v1399_v17 = vadd.f32 %v1397_v27, %v1389_v56 }
 0xee1   :  { %2188 = vtanh.f32 %v1399_v17 }
 0xee7   :  { %v2189_v46 = vpop.eup %2188 }
 0xee8   :  { %1402 = vrot.lane.b32.xlu0 %v2189_v46, %s2312_s4 }
 0xf5a   :  { %v1403_v26 = vpop.permute.xlu0 %1402 }
 0xf5b   :  { %v1405_v63 = vmul.f32 %v1403_v26, %v1386_v61 }
 0xf5d   :  { %1407 = vrot.lane.b32.xlu1 %v1405_v63, %s2313_s24 }
 0xfcf   :  { %v1408_v0 = vpop.permute.xlu1 %1407 }
 0xfd0   :  { %2055 = vmatmul.msk.f32.vlgmr.msra.gmra.mxu0 %vm181_vm8, %v1408_v0 }
0x104d   :  { %v1428_v36 = vpop.f32.mrf.mxu0 }
0x104e   :  { %v1431_v5 = vadd.f32 %v1428_v36, %v1334_v40  ;;  %v1281_v40 = vpop.f32.mrf.mxu3 }
0x1050   :  { %2190 = vtanh.f32 %v1431_v5  ;;  %v2056_v14 = vmul.f32 -1.442695, %v1431_v5 }
0x1052   :  { %2192 = vpow2.f32 %v2056_v14  ;;  %v1279_v14 = vadd.f32 %v1278_v23, %v3046_v2 }
0x1056   :  { %v2191_v43 = vpop.eup %2190  ;;  %v3089_v36 = vpop.f32.mrf.mxu3 }
0x1057   :  { %1454 = vrot.lane.b32.xlu2 %v2191_v43, %s2312_s4 }
0x1058   :  { %v2193_v22 = vpop.eup %2192 }
0x1059   :  { %v1435_v35 = vadd.f32 1.0, %v2193_v22  ;;  %v1336_v22 = vadd.f32 %v3062_v52, %v1279_v14  ;;  %v1285_v14 = vadd.f32 %v3089_v36, %v3050_v44 }
0x105b   :  { %2194 = vrcp.f32 %v1435_v35  ;;  %v1447_v18 = vand.u32 2147483648, %v1435_v35  ;;  %vm1441_vm1 = vweird.f32 %v1435_v35  ;;  %v1445_v9 = vand.u32 2147483647, %v1435_v35 }
0x105d   :  { %v1448_v12 = vor.u32 1.1754944e-38, %v1447_v18  ;;  %vm1446_vm9 = vcmp.eq.f32.partialorder %v1445_v9, 8.507059e+37 }
0x105e   :  { %v3091_v5 = vpop.f32.mrf.mxu3 }
0x1061   :  { %v2195_v24 = vpop.eup %2194 }
0x1062   :  { %v1437_v6 = vmul.f32 %v2195_v24, %v1435_v35  ;;  %vm1442_vm0 = vweird.f32 %v2195_v24 }
0x1063   :  { %vm1443_vm2 = vmor %vm1441_vm1, %vm1442_vm0 }
0x1064   :  { %v1438_v41 = vsub.f32 1.0, %v1437_v6 }
0x1066   :  { %v1439_v30 = vmul.f32 %v2195_v24, %v1438_v41 }
0x1068   :  { %v1440_v45 = vadd.f32 %v2195_v24, %v1439_v30 }
0x106a   :  { %v1444_v62 = vsel %vm1443_vm2, %v2195_v24, %v1440_v45 }
0x106b   :  { %v1449_v28 = vsel %vm1446_vm9, %v1448_v12, %v1444_v62 }
0x106c   :  { %v1452_v37 = vmul.f32 %v1449_v28, %v1399_v17 }
0x10b1   :  { %v1455_v11 = vpop.permute.xlu2 %1454 }
0x10b2   :  { %v1457_v51 = vmul.f32 %v1455_v11, %v1449_v28 }
0x10b4   :  { %1459 = vrot.lane.b32.xlu0 %v1457_v51, %s2313_s24 }
0x1126   :  { %v1460_v33 = vpop.permute.xlu0 %1459 }
0x1127   :  { %v1462_v7 = vadd.f32 %v1460_v33, %v1452_v37 }
0x1129   :  { %2196 = vtanh.f32 %v1462_v7 }
0x112f   :  { %v2197_v25 = vpop.eup %2196 }
0x1130   :  { %1465 = vrot.lane.b32.xlu1 %v2197_v25, %s2312_s4 }
0x11a2   :  { %v1466_v3 = vpop.permute.xlu1 %1465 }
0x11a3   :  { %v1468_v49 = vmul.f32 %v1466_v3, %v1449_v28 }
0x11a5   :  { %1470 = vrot.lane.b32.xlu2 %v1468_v49, %s2313_s24 }
0x11ff   :  { %v1471_v50 = vpop.permute.xlu2 %1470 }
0x1200   :  { %2057 = vmatmul.msk.f32.vlgmr.msra.gmra.mxu2 %vm181_vm8, %v1471_v50 }
0x1283   :  { %v1491_v20 = vpop.f32.mrf.mxu2 }
0x1284   :  { %v1494_v21 = vadd.f32 %v1491_v20, %v1335_v10 }
0x1286   :  { %2198 = vtanh.f32 %v1494_v21  ;;  %v2058_v54 = vmul.f32 -1.442695, %v1494_v21  ;;  %v1282_v21 = vadd.f32 %v1281_v40, %v3048_v8 }
0x1288   :  { %2200 = vpow2.f32 %v2058_v54 }
0x128c   :  { %v2199_v42 = vpop.eup %2198 }
0x128d   :  { %1517 = vrot.lane.b32.xlu0 %v2199_v42, %s2312_s4  ;;  %v1337_v42 = vadd.f32 %v3062_v52, %v1282_v21 }
0x128e   :  { %v2201_v55 = vpop.eup %2200 }
0x128f   :  { %v1498_v57 = vadd.f32 1.0, %v2201_v55 }
0x1291   :  { %2202 = vrcp.f32 %v1498_v57  ;;  %v1510_v34 = vand.u32 2147483648, %v1498_v57  ;;  %vm1504_vm4 = vweird.f32 %v1498_v57  ;;  %v1508_v38 = vand.u32 2147483647, %v1498_v57 }
0x1293   :  { %v1511_v59 = vor.u32 1.1754944e-38, %v1510_v34  ;;  %vm1509_vm10 = vcmp.eq.f32.partialorder %v1508_v38, 8.507059e+37 }
0x1295   :  { %1234 = vrot.lane.b32.xlu0 %v3007_v32, %s2312_s4 }
0x1297   :  { %v2203_v58 = vpop.eup %2202 }
0x1298   :  { %v1500_v15 = vmul.f32 %v2203_v58, %v1498_v57  ;;  %vm1505_vm3 = vweird.f32 %v2203_v58 }
0x1299   :  { %vm1506_vm5 = vmor %vm1504_vm4, %vm1505_vm3 }
0x129a   :  { %v1501_v13 = vsub.f32 1.0, %v1500_v15 }
0x129c   :  { %v1502_v39 = vmul.f32 %v2203_v58, %v1501_v13 }
0x129e   :  { %v1503_v1 = vadd.f32 %v2203_v58, %v1502_v39 }
0x12a0   :  { %v1507_v60 = vsel %vm1506_vm5, %v2203_v58, %v1503_v1 }
0x12a1   :  { %v1512_v32 = vsel %vm1509_vm10, %v1511_v59, %v1507_v60 }
0x12a2   :  { %v1515_v27 = vmul.f32 %v1512_v32, %v1462_v7 }
0x12ff   :  { %v1518_v61 = vpop.permute.xlu0 %1517 }
0x1300   :  { %v1520_v19 = vmul.f32 %v1518_v61, %v1512_v32 }
0x1302   :  { %1522 = vrot.lane.b32.xlu1 %v1520_v19, %s2313_s24 }
0x1307   :  { %v1235_v56 = vpop.permute.xlu0 %1234 }
0x1308   :  { %2045 = vmatmul.msk.f32.gmra.mxu3 %vm181_vm8, %v1235_v56  ;;  %2053 = vmatmul.msk.f32.gmra.mxu1 %vm181_vm8, %v1235_v56 }
0x1374   :  { %v1523_v17 = vpop.permute.xlu1 %1522 }
0x1375   :  { %v1525_v46 = vadd.f32 %v1523_v17, %v1515_v27 }
0x1377   :  { %2204 = vtanh.f32 %v1525_v46 }
0x137d   :  { %v2205_v26 = vpop.eup %2204 }
0x137e   :  { %1528 = vrot.lane.b32.xlu2 %v2205_v26, %s2312_s4 }
0x1385   :  { %v3109_v40 = vpop.f32.mrf.mxu1 }
0x138b   :  { %v3093_v43 = vpop.f32.mrf.mxu3 }
0x13d8   :  { %v1529_v63 = vpop.permute.xlu2 %1528 }
0x13d9   :  { %v1531_v0 = vmul.f32 %v1529_v63, %v1512_v32 }
0x13db   :  { %1533 = vrot.lane.b32.xlu1 %v1531_v0, %s2313_s24 }
0x144d   :  { %v1534_v16 = vpop.permute.xlu1 %1533 }
0x144e   :  { %2059 = vmatmul.msk.f32.vlgmr.msra.gmra.mxu3 %vm181_vm8, %v1534_v16 }
0x14d1   :  { %v1554_v35 = vpop.f32.mrf.mxu3 }
0x14d2   :  { %v1557_v24 = vadd.f32 %v1554_v35, %v1336_v22  ;;  %v1338_v22 = vadd.f32 %v3062_v52, %v1285_v14  ;;  %v1291_v14 = vadd.f32 %v3093_v43, %v3054_v47 }
0x14d4   :  { %2206 = vtanh.f32 %v1557_v24  ;;  %v2060_v41 = vmul.f32 -1.442695, %v1557_v24 }
0x14d6   :  { %2208 = vpow2.f32 %v2060_v41 }
0x14da   :  { %v2207_v6 = vpop.eup %2206 }
0x14db   :  { %1580 = vrot.lane.b32.xlu2 %v2207_v6, %s2312_s4 }
0x14dc   :  { %v2209_v30 = vpop.eup %2208 }
0x14dd   :  { %v1561_v45 = vadd.f32 1.0, %v2209_v30 }
0x14df   :  { %2210 = vrcp.f32 %v1561_v45  ;;  %v1573_v2 = vand.u32 2147483648, %v1561_v45  ;;  %vm1567_vm7 = vweird.f32 %v1561_v45  ;;  %v1571_v28 = vand.u32 2147483647, %v1561_v45 }
0x14e1   :  { %v1574_v37 = vor.u32 1.1754944e-38, %v1573_v2  ;;  %vm1572_vm12 = vcmp.eq.f32.partialorder %v1571_v28, 8.507059e+37 }
0x14e5   :  { %v2211_v18 = vpop.eup %2210 }
0x14e6   :  { %v1563_v9 = vmul.f32 %v2211_v18, %v1561_v45  ;;  %vm1568_vm6 = vweird.f32 %v2211_v18 }
0x14e7   :  { %vm1569_vm11 = vmor %vm1567_vm7, %vm1568_vm6 }
0x14e8   :  { %v1564_v62 = vsub.f32 1.0, %v1563_v9 }
0x14ea   :  { %v1565_v12 = vmul.f32 %v2211_v18, %v1564_v62 }
0x14ec   :  { %v1566_v11 = vadd.f32 %v2211_v18, %v1565_v12 }
0x14ee   :  { %v1570_v51 = vsel %vm1569_vm11, %v2211_v18, %v1566_v11 }
0x14ef   :  { %v1575_v7 = vsel %vm1572_vm12, %v1574_v37, %v1570_v51 }
0x14f0   :  { %v1578_v3 = vmul.f32 %v1575_v7, %v1525_v46 }
0x1535   :  { %v1581_v33 = vpop.permute.xlu2 %1580 }
0x1536   :  { %v1583_v25 = vmul.f32 %v1581_v33, %v1575_v7 }
0x1538   :  { %1585 = vrot.lane.b32.xlu0 %v1583_v25, %s2313_s24 }
0x15aa   :  { %v1586_v49 = vpop.permute.xlu0 %1585 }
0x15ab   :  { %v1588_v50 = vadd.f32 %v1586_v49, %v1578_v3 }
0x15ad   :  { %2212 = vtanh.f32 %v1588_v50 }
0x15b3   :  { %v2213_v53 = vpop.eup %2212 }
0x15b4   :  { %1591 = vrot.lane.b32.xlu1 %v2213_v53, %s2312_s4 }
0x1626   :  { %v1592_v31 = vpop.permute.xlu1 %1591 }
0x1627   :  { %v1594_v10 = vmul.f32 %v1592_v31, %v1575_v7 }
0x1629   :  { %1596 = vrot.lane.b32.xlu2 %v1594_v10, %s2313_s24  ;;  %v1288_v10 = vadd.f32 %v3091_v5, %v3052_v4 }
0x1683   :  { %v1597_v20 = vpop.permute.xlu2 %1596 }
0x1684   :  { %2061 = vmatmul.msk.f32.vlgmr.msrb.gmra.mxu0 %vm181_vm8, %v1597_v20  ;;  %v1339_v20 = vadd.f32 %v3062_v52, %v1288_v10 }
0x1701   :  { %v1617_v54 = vpop.f32.mrf.mxu0 }
0x1702   :  { %v1620_v55 = vadd.f32 %v1617_v54, %v1337_v42 }
0x1704   :  { %2214 = vtanh.f32 %v1620_v55  ;;  %v2062_v58 = vmul.f32 -1.442695, %v1620_v55 }
0x1706   :  { %2216 = vpow2.f32 %v2062_v58 }
0x170a   :  { %v2215_v57 = vpop.eup %2214 }
0x170b   :  { %1643 = vrot.lane.b32.xlu0 %v2215_v57, %s2312_s4 }
0x170c   :  { %v2217_v15 = vpop.eup %2216 }
0x170d   :  { %v1624_v13 = vadd.f32 1.0, %v2217_v15 }
0x170f   :  { %2218 = vrcp.f32 %v1624_v13  ;;  %v1636_v8 = vand.u32 2147483648, %v1624_v13  ;;  %vm1630_vm14 = vweird.f32 %v1624_v13  ;;  %v1634_v59 = vand.u32 2147483647, %v1624_v13 }
0x1711   :  { %v1637_v32 = vor.u32 1.1754944e-38, %v1636_v8  ;;  %vm1635_vm0 = vcmp.eq.f32.partialorder %v1634_v59, 8.507059e+37 }
0x1715   :  { %v2219_v39 = vpop.eup %2218 }
0x1716   :  { %v1626_v1 = vmul.f32 %v2219_v39, %v1624_v13  ;;  %vm1631_vm13 = vweird.f32 %v2219_v39 }
0x1717   :  { %vm1632_vm15 = vmor %vm1630_vm14, %vm1631_vm13 }
0x1718   :  { %v1627_v34 = vsub.f32 1.0, %v1626_v1 }
0x171a   :  { %v1628_v38 = vmul.f32 %v2219_v39, %v1627_v34 }
0x171c   :  { %v1629_v60 = vadd.f32 %v2219_v39, %v1628_v38 }
0x171e   :  { %v1633_v61 = vsel %vm1632_vm15, %v2219_v39, %v1629_v60 }
0x171f   :  { %v1638_v56 = vsel %vm1635_vm0, %v1637_v32, %v1633_v61 }
0x1720   :  { %v1641_v17 = vmul.f32 %v1638_v56, %v1588_v50 }
0x177d   :  { %v1644_v19 = vpop.permute.xlu0 %1643 }
0x177e   :  { %v1646_v27 = vmul.f32 %v1644_v19, %v1638_v56 }
0x1780   :  { %1648 = vrot.lane.b32.xlu1 %v1646_v27, %s2313_s24 }
0x17f2   :  { %v1649_v46 = vpop.permute.xlu1 %1648 }
0x17f3   :  { %v1651_v26 = vadd.f32 %v1649_v46, %v1641_v17  ;;  %v1325_v17 = vadd.f32 %v3109_v40, %v3070_v29  ;;  %v1330_v46 = vperm.slane %v3059_v48, 1 }
0x17f5   :  { %2220 = vtanh.f32 %v1651_v26 }
0x17fb   :  { %v2221_v63 = vpop.eup %2220 }
0x17fc   :  { %1654 = vrot.lane.b32.xlu2 %v2221_v63, %s2312_s4 }
0x1856   :  { %v1655_v0 = vpop.permute.xlu2 %1654 }
0x1857   :  { %v1657_v16 = vmul.f32 %v1655_v0, %v1638_v56 }
0x1859   :  { %1659 = vrot.lane.b32.xlu0 %v1657_v16, %s2313_s24 }
0x18cb   :  { %v1660_v23 = vpop.permute.xlu0 %1659 }
0x18cc   :  { %2063 = vmatmul.msk.f32.vlgmr.msra.gmra.mxu1 %vm181_vm8, %v1660_v23 }
0x1949   :  { %v1680_v35 = vpop.f32.mrf.mxu1 }
0x194a   :  { %v1683_v24 = vadd.f32 %v1680_v35, %v1338_v22  ;;  %v1340_v22 = vadd.f32 %v3062_v52, %v1291_v14 }
0x194c   :  { %2222 = vtanh.f32 %v1683_v24  ;;  %v2064_v41 = vmul.f32 -1.442695, %v1683_v24 }
0x194e   :  { %2224 = vpow2.f32 %v2064_v41 }
0x1952   :  { %v2223_v6 = vpop.eup %2222 }
0x1953   :  { %1706 = vrot.lane.b32.xlu1 %v2223_v6, %s2312_s4 }
0x1954   :  { %v2225_v30 = vpop.eup %2224 }
0x1955   :  { %v1687_v45 = vadd.f32 1.0, %v2225_v30 }
0x1957   :  { %2226 = vrcp.f32 %v1687_v45  ;;  %v1699_v44 = vand.u32 2147483648, %v1687_v45  ;;  %vm1693_vm2 = vweird.f32 %v1687_v45  ;;  %v1697_v36 = vand.u32 2147483647, %v1687_v45 }
0x1959   :  { %v1700_v28 = vor.u32 1.1754944e-38, %v1699_v44  ;;  %vm1698_vm3 = vcmp.eq.f32.partialorder %v1697_v36, 8.507059e+37 }
0x195d   :  { %v2227_v18 = vpop.eup %2226 }
0x195e   :  { %v1689_v9 = vmul.f32 %v2227_v18, %v1687_v45  ;;  %vm1694_vm1 = vweird.f32 %v2227_v18 }
0x195f   :  { %vm1695_vm9 = vmor %vm1693_vm2, %vm1694_vm1  ;;  %vm1941_vm2 = vcmask 254976  }
0x1960   :  { %v1690_v62 = vsub.f32 1.0, %v1689_v9 }
0x1962   :  { %v1691_v12 = vmul.f32 %v2227_v18, %v1690_v62 }
0x1964   :  { %v1692_v11 = vadd.f32 %v2227_v18, %v1691_v12 }
0x1966   :  { %v1696_v2 = vsel %vm1695_vm9, %v2227_v18, %v1692_v11 }
0x1967   :  { %v1701_v37 = vsel %vm1698_vm3, %v1700_v28, %v1696_v2 }
0x1968   :  { %v1704_v7 = vmul.f32 %v1701_v37, %v1651_v26  ;;  %v1341_v26 = vadd.f32 %v1330_v46, %v1325_v17 }
0x196a   :  { %v2069_v35 = vmul.f32 -1.442695, %v1341_v26 }
0x19c5   :  { %v1707_v51 = vpop.permute.xlu1 %1706 }
0x19c6   :  { %v1709_v33 = vmul.f32 %v1707_v51, %v1701_v37 }
0x19c8   :  { %1711 = vrot.lane.b32.xlu2 %v1709_v33, %s2313_s24 }
0x1a22   :  { %v1712_v25 = vpop.permute.xlu2 %1711 }
0x1a23   :  { %v1714_v3 = vadd.f32 %v1712_v25, %v1704_v7 }
0x1a25   :  { %2228 = vtanh.f32 %v1714_v3 }
0x1a2b   :  { %v2229_v49 = vpop.eup %2228 }
0x1a2c   :  { %1717 = vrot.lane.b32.xlu0 %v2229_v49, %s2312_s4 }
0x1a9e   :  { %v1718_v50 = vpop.permute.xlu0 %1717 }
0x1a9f   :  { %v1720_v53 = vmul.f32 %v1718_v50, %v1701_v37 }
0x1aa1   :  { %1722 = vrot.lane.b32.xlu1 %v1720_v53, %s2313_s24 }
0x1b13   :  { %v1723_v31 = vpop.permute.xlu1 %1722 }
0x1b14   :  { %2065 = vmatmul.msk.f32.vlgmr.msrb.gmra.mxu2 %vm181_vm8, %v1723_v31 }
0x1b97   :  { %v1743_v21 = vpop.f32.mrf.mxu2 }
0x1b98   :  { %v1746_v42 = vadd.f32 %v1743_v21, %v1339_v20 }
0x1b9a   :  { %2230 = vtanh.f32 %v1746_v42  ;;  %v2066_v55 = vmul.f32 -1.442695, %v1746_v42  ;;  %v1885_v42 = vld [vmem:[%s3183_s8 + $0x38] sm:$0xff] }
0x1b9b   :  { %1903 = vmatpush.msra.mxu0 %v1885_v42 }
0x1b9c   :  { %2232 = vpow2.f32 %v2066_v55  ;;  %v1883_v55 = vld [vmem:[%s3183_s8 + $0x28] sm:$0xff] }
0x1ba0   :  { %v2231_v54 = vpop.eup %2230 }
0x1ba1   :  { %1769 = vrot.lane.b32.xlu2 %v2231_v54, %s2312_s4  ;;  %v1884_v54 = vld [vmem:[%s3183_s8 + $0x30] sm:$0xff] }
0x1ba2   :  { %v2233_v57 = vpop.eup %2232  ;;  %1904 = vmatpush.msra.mxu0 %v1884_v54 }
0x1ba3   :  { %v1750_v58 = vadd.f32 1.0, %v2233_v57  ;;  %v1882_v57 = vld [vmem:[%s3183_s8 + $0x20] sm:$0xff] }
0x1ba4   :  { %1905 = vmatpush.msra.mxu0 %v1883_v55 }
0x1ba5   :  { %2234 = vrcp.f32 %v1750_v58  ;;  %v1762_v4 = vand.u32 2147483648, %v1750_v58  ;;  %vm1756_vm5 = vweird.f32 %v1750_v58  ;;  %v1760_v5 = vand.u32 2147483647, %v1750_v58 }
0x1ba6   :  { %1906 = vmatpush.msra.mxu0 %v1882_v57 }
0x1ba7   :  { %v1763_v60 = vor.u32 1.1754944e-38, %v1762_v4  ;;  %vm1761_vm6 = vcmp.eq.f32.partialorder %v1760_v5, 8.507059e+37 }
0x1bab   :  { %v2235_v15 = vpop.eup %2234 }
0x1bac   :  { %v1752_v13 = vmul.f32 %v2235_v15, %v1750_v58  ;;  %vm1757_vm4 = vweird.f32 %v2235_v15 }
0x1bad   :  { %vm1758_vm10 = vmor %vm1756_vm5, %vm1757_vm4 }
0x1bae   :  { %v1753_v39 = vsub.f32 1.0, %v1752_v13 }
0x1bb0   :  { %v1754_v1 = vmul.f32 %v2235_v15, %v1753_v39 }
0x1bb2   :  { %v1755_v34 = vadd.f32 %v2235_v15, %v1754_v1 }
0x1bb4   :  { %v1759_v38 = vsel %vm1758_vm10, %v2235_v15, %v1755_v34 }
0x1bb5   :  { %v1764_v59 = vsel %vm1761_vm6, %v1763_v60, %v1759_v38  ;;  %v1881_v60 = vld [vmem:[%s3183_s8 + $0x18] sm:$0xff] }
0x1bb6   :  { %v1767_v32 = vmul.f32 %v1764_v59, %v1714_v3  ;;  %1928 = vmatpush.msrb.mxu1 %v1881_v60 }
0x1bfb   :  { %v1770_v8 = vpop.permute.xlu2 %1769 }
0x1bfc   :  { %v1772_v61 = vmul.f32 %v1770_v8, %v1764_v59  ;;  %v1880_v8 = vld [vmem:[%s3183_s8 + $0x10] sm:$0xff] }
0x1bfd   :  { %1929 = vmatpush.msrb.mxu1 %v1880_v8 }
0x1bfe   :  { %1774 = vrot.lane.b32.xlu0 %v1772_v61, %s2313_s24  ;;  %v1878_v61 = vld [vmem:[%s3183_s8] sm:$0xff] }
0x1c70   :  { %v1775_v19 = vpop.permute.xlu0 %1774 }
0x1c71   :  { %v3124_v56 = vadd.f32 %v1775_v19, %v1767_v32  ;;  %v2085_v19 = vld [vmem:[%s3184_s9] ss:$0 sm:$0xff] }
0x1c73   :  { %2236 = vtanh.f32 %v3124_v56 }
0x1c74   :  { %2238 = vtanh.f32 %v1341_v26 }
0x1c79   :  { %v2237_v27 = vpop.eup %2236 }
0x1c7a   :  { %1780 = vrot.lane.b32.xlu1 %v2237_v27, %s2312_s4  ;;  %v2239_v16 = vpop.eup %2238 }
0x1cec   :  { %v1781_v63 = vpop.permute.xlu1 %1780 }
0x1ced   :  { %v1783_v0 = vmul.f32 %v1781_v63, %v1764_v59  ;;  %v1879_v59 = vld [vmem:[%s3183_s8 + $0x8] sm:$0xff] }
0x1cee   :  { %1930 = vmatpush.msrb.mxu1 %v1879_v59 }
0x1cef   :  { %1785 = vrot.lane.b32.xlu2 %v1783_v0, %s2313_s24 }
0x1cf0   :  { %1931 = vmatpush.msrb.mxu1 %v1878_v61 }
0x1cf7   :  { %1868 = vrot.lane.b32.xlu2 %v2239_v16, %s2312_s4 }
0x1d49   :  { %v1786_v23 = vpop.permute.xlu2 %1785 }
0x1d4a   :  { %2067 = vmatmul.msk.f32.vlgmr.msrb.gmra.mxu3 %vm181_vm8, %v1786_v23 }
0x1d51   :  { %v1869_v25 = vpop.permute.xlu2 %1868 }
0x1dcd   :  { %v1806_v29 = vpop.f32.mrf.mxu3 }
0x1dce   :  { %v1809_v40 = vadd.f32 %v1806_v29, %v1340_v22 }
0x1dd0   :  { %2240 = vtanh.f32 %v1809_v40  ;;  %v2068_v24 = vmul.f32 -1.442695, %v1809_v40 }
0x1dd1   :  { %2242 = vpow2.f32 %v2069_v35 }
0x1dd2   :  { %2244 = vpow2.f32 %v2068_v24 }
0x1dd6   :  { %v2241_v48 = vpop.eup %2240 }
0x1dd7   :  { %1832 = vrot.lane.b32.xlu0 %v2241_v48, %s2312_s4  ;;  %v2243_v6 = vpop.eup %2242 }
0x1dd8   :  { %v2245_v41 = vpop.eup %2244  ;;  %v1850_v30 = vadd.f32 1.0, %v2243_v6 }
0x1dd9   :  { %v1813_v45 = vadd.f32 1.0, %v2245_v41 }
0x1dda   :  { %2246 = vrcp.f32 %v1850_v30  ;;  %v1862_v36 = vand.u32 2147483648, %v1850_v30  ;;  %vm1856_vm12 = vweird.f32 %v1850_v30  ;;  %v1860_v28 = vand.u32 2147483647, %v1850_v30 }
0x1ddb   :  { %2248 = vrcp.f32 %v1813_v45  ;;  %v1825_v51 = vand.u32 2147483648, %v1813_v45  ;;  %vm1819_vm14 = vweird.f32 %v1813_v45  ;;  %v1823_v37 = vand.u32 2147483647, %v1813_v45 }
0x1ddc   :  { %v1863_v7 = vor.u32 1.1754944e-38, %v1862_v36  ;;  %vm1861_vm0 = vcmp.eq.f32.partialorder %v1860_v28, 8.507059e+37 }
0x1ddd   :  { %v1826_v49 = vor.u32 1.1754944e-38, %v1825_v51  ;;  %vm1824_vm1 = vcmp.eq.f32.partialorder %v1823_v37, 8.507059e+37 }
0x1de0   :  { %v2247_v18 = vpop.eup %2246 }
0x1de1   :  { %v2249_v47 = vpop.eup %2248  ;;  %v1852_v43 = vmul.f32 %v2247_v18, %v1850_v30  ;;  %vm1857_vm7 = vweird.f32 %v2247_v18 }
0x1de2   :  { %v1815_v52 = vmul.f32 %v2249_v47, %v1813_v45  ;;  %vm1820_vm11 = vweird.f32 %v2249_v47  ;;  %vm1858_vm13 = vmor %vm1856_vm12, %vm1857_vm7 }
0x1de3   :  { %v1853_v9 = vsub.f32 1.0, %v1852_v43  ;;  %vm1821_vm15 = vmor %vm1819_vm14, %vm1820_vm11 }
0x1de4   :  { %v1816_v62 = vsub.f32 1.0, %v1815_v52 }
0x1de5   :  { %v1854_v12 = vmul.f32 %v2247_v18, %v1853_v9 }
0x1de6   :  { %v1817_v11 = vmul.f32 %v2249_v47, %v1816_v62 }
0x1de7   :  { %v1855_v44 = vadd.f32 %v2247_v18, %v1854_v12 }
0x1de8   :  { %v1818_v2 = vadd.f32 %v2249_v47, %v1817_v11 }
0x1de9   :  { %v1859_v33 = vsel %vm1858_vm13, %v2247_v18, %v1855_v44 }
0x1dea   :  { %v1822_v3 = vsel %vm1821_vm15, %v2249_v47, %v1818_v2  ;;  %v1864_v50 = vsel %vm1861_vm0, %v1863_v7, %v1859_v33 }
0x1deb   :  { %v1871_v53 = vmul.f32 %v1869_v25, %v1864_v50  ;;  %v1827_v10 = vsel %vm1824_vm1, %v1826_v49, %v1822_v3 }
0x1dec   :  { %v1830_v58 = vmul.f32 %v1827_v10, %v3124_v56 }
0x1ded   :  { %2250 = vtanh.f32 %v1871_v53 }
0x1df3   :  { %v2251_v21 = vpop.eup %2250 }
0x1e49   :  { %v1833_v31 = vpop.permute.xlu0 %1832 }
0x1e4a   :  { %v1835_v20 = vmul.f32 %v1833_v31, %v1827_v10 }
0x1e4c   :  { %1837 = vrot.lane.b32.xlu1 %v1835_v20, %s2313_s24 }
0x1e54   :  { %1874 = vrot.lane.b32.xlu1 %v2251_v21, %s2314_s7 }
0x1ebe   :  { %v1838_v15 = vpop.permute.xlu1 %1837 }
0x1ebf   :  { %v1840_v13 = vadd.f32 %v1838_v15, %v1830_v58 }
0x1ec1   :  { %2252 = vtanh.f32 %v1840_v13 }
0x1ec6   :  { %v1875_v39 = vpop.permute.xlu1 %1874 }
0x1ec7   :  { %v2253_v1 = vpop.eup %2252  ;;  %v1877_v34 = vmul.f32 %v1875_v39, %v1864_v50 }
0x1ec8   :  { %1843 = vrot.lane.b32.xlu0 %v2253_v1, %s2312_s4 }
0x1ec9   :  { %1887 = vrot.lane.b32.xlu2 %v1877_v34, %s2313_s24 }
0x1f23   :  { %v1888_v4 = vpop.permute.xlu2 %1887 }
0x1f24   :  { %2070 = vmatmul.msk.f32.vlgmr.msra.gmra.mxu0 %vm181_vm8, %v1888_v4 }
0x1f3a   :  { %v1844_v5 = vpop.permute.xlu0 %1843 }
0x1f3b   :  { %v1846_v38 = vmul.f32 %v1844_v5, %v1827_v10 }
0x1f3d   :  { %1912 = vrot.lane.b32.xlu0 %v1846_v38, %s2313_s24 }
0x1fa1   :  { %v1908_v56 = vpop.f32.mrf.mxu0 }
0x1faf   :  { %v1913_v32 = vpop.permute.xlu0 %1912 }
0x1fb0   :  { %2071 = vmatmul.msk.f32.vlgmr.msrb.gmra.mxu1 %vm181_vm8, %v1913_v32 }
0x202d   :  { %v1933_v27 = vpop.f32.mrf.mxu1 }
0x202e   :  { %v1934_v17 = vadd.f32 %v1933_v27, %v1908_v56 }
0x2030   :  { %v1940_v46 = vadd.f32 %v2085_v19, %v1934_v17 }
0x2032   :  { %1942 = vst.msk [vmem:[#allocation5] sm:$0x3] %vm1941_vm2, %v1940_v46 }
0x2033   :  { %1953 = dma.vmem_to_hbm [thread:$0]  %s1949_s27, 32, %s1951_s30, [#allocation4]  }
0x2034   :  { %2304 = dma.done.wait [#allocation4], 32  }
0x2035   :  { %2305 = vsyncadd [#allocation4], 4294967264 }
0x2036   :  { %1958 = vsyncpa [#allocation3], 1 }
0x2037   :  { %1959 = vsyncpa [#allocation4], 1 }

</bundles_post_ra>
